<compile_context>
chip_gen: v7x
topology: tpu7x:2x2x1
jax: 0.10.0
libtpu: 0.0.40
codegen_flags: <defaults>
</compile_context>

<pallas_src>
import jax
import jax.numpy as jnp
from jax.experimental import pallas as pl
from jax.experimental.pallas import tpu as pltpu


def _vis_inter_kernel(
    v_ref,        # (tm, 3, H)  node tile of vector features
    wc_ref,       # (3, H)      WOperator.weight (squeezed), compute dtype
    wab_ref,      # (2H, H)     composed [W_w.T @ W_2a.T ; W_1.T @ W_2b.T], compute dtype
    wwt_ref,      # (H, H)      W_w.T (s path), compute dtype
    const_ref,    # (3, H)      composed bias constants for v_out, f32
    nbs_ref,      # (1, H)      sum of normalized b_w rows (s path), f32
    vout_ref,     # (tm, 3, H)  output v_out
    s_ref,        # (tm, H)     output s
):
    f32 = jnp.float32

    # Component slices (VMEM-side sublane gather; avoids an HBM relayout pass in the wrapper).
    vt = v_ref[...]
    v0 = vt[:, 0, :]
    v1 = vt[:, 1, :]
    v2 = vt[:, 2, :]

    # cross(v, w_cross) along the 3-axis -- pure VPU work (rides otherwise-free VALU slots).
    wc = wc_ref[...]
    cw0, cw1, cw2 = wc[0:1, :], wc[1:2, :], wc[2:3, :]
    c0 = v1 * cw2 - v2 * cw1
    c1 = v2 * cw0 - v0 * cw2
    c2 = v0 * cw1 - v1 * cw0

    wab = wab_ref[...]
    const = const_ref[...]

    # v_out_k = [cross_k | v_k] @ [Wa ; Wb] + const_k    (single K=2H matmul per component)
    o0 = jnp.dot(jnp.concatenate([c0, v0], axis=-1), wab,
                 preferred_element_type=f32) + const[0:1, :]
    o1 = jnp.dot(jnp.concatenate([c1, v1], axis=-1), wab,
                 preferred_element_type=f32) + const[1:2, :]
    o2 = jnp.dot(jnp.concatenate([c2, v2], axis=-1), wab,
                 preferred_element_type=f32) + const[2:3, :]
    vout_ref[:, 0, :] = o0.astype(vout_ref.dtype)
    vout_ref[:, 1, :] = o1.astype(vout_ref.dtype)
    vout_ref[:, 2, :] = o2.astype(vout_ref.dtype)

    # s = sum_k (v_k @ W_w.T + nb_w_k) == (v0+v1+v2) @ W_w.T + sum_k nb_w_k  (linearity fold)
    vsum = v0 + v1 + v2
    s = jnp.dot(vsum, wwt_ref[...], preferred_element_type=f32) + nbs_ref[...]
    s_ref[...] = s.astype(s_ref.dtype)


def _round_up(a, b):
    return ((a + b - 1) // b) * b


def _normalized_bias_t(b, bias_norm):
    """b: (out, 3). Returns (3, out) = (b / max(||b||_row, bias_norm)).T in f32."""
    b = b.astype(jnp.float32)
    nrm = jnp.sqrt(jnp.sum(b * b, axis=1) + 1e-8)
    nrm = jnp.maximum(nrm, bias_norm)
    return jnp.transpose(b / nrm[:, None])


def vis_inter_action(x, v, params, *, bias_norm=1e-6, tile_m=512,
                     vmem_node_budget=12 << 20):
    """Forward pass of VisInterAction.

    x: (N, H) scalar features -- unused by the reference forward (kept for API parity).
    v: (N, 3, H) vector features.
    params:
      "w_cross": (1, 3, H)               WOperator.weight
      "w_w": (H, H),  "b_w": (H, 3)      WOperator.linear   (LinearBiasSmall)
      "w_1": (H, H),  "b_1": (H, 3)      VecLinear.linear_1 (LinearBiasSmall)
      "w_2": (H, 2H), "b_2": (H, 3)      VecLinear.linear_2 (LinearBiasSmall)
    Returns (v_out, s): v_out (N, 3, H), s (N, H).
    """
    del x  # unused by the reference forward
    N, three, H = v.shape
    assert three == 3
    dtype = v.dtype
    f32 = jnp.float32
    itemsize = jnp.dtype(dtype).itemsize

    # ---- one-time weight/bias composition (f32, amortized over all N nodes) ----
    wc = jnp.reshape(params["w_cross"], (3, H)).astype(dtype)
    wwt = jnp.transpose(params["w_w"]).astype(f32)        # (H, H)
    w1t = jnp.transpose(params["w_1"]).astype(f32)        # (H, H)
    w2 = params["w_2"].astype(f32)                        # (H, 2H)
    w2at = jnp.transpose(w2[:, :H])                       # (H, H)
    w2bt = jnp.transpose(w2[:, H:])                       # (H, H)

    nbw = _normalized_bias_t(params["b_w"], bias_norm)    # (3, H)
    nb1 = _normalized_bias_t(params["b_1"], bias_norm)    # (3, H)
    nb2 = _normalized_bias_t(params["b_2"], bias_norm)    # (3, H)

    # o_k = cross_k @ (W_w.T @ W_2a.T) + v_k @ (W_1.T @ W_2b.T)
    #       + (nb_w_k @ W_2a.T + nb_1_k @ W_2b.T + nb_2_k)
    wa = wwt @ w2at
    wb = w1t @ w2bt
    wab = jnp.concatenate([wa, wb], axis=0).astype(dtype)  # (2H, H), K=2H matmul operand
    const = nbw @ w2at + nb1 @ w2bt + nb2                  # (3, H), f32
    nbs = jnp.sum(nbw, axis=0, keepdims=True)              # (1, H), f32
    wwt_c = wwt.astype(dtype)

    # ---- node tiling ----
    # VMEM per node row: v-in (3->8 sublane-padded) + v-out (padded) + s, double-buffered.
    row_bytes = (8 + 8 + 1) * H * itemsize * 2
    tm_budget = max(8, ((vmem_node_budget // row_bytes) // 8) * 8)   # v7x-safe working set
    tm_half = _round_up(-(-N // 2), 8)        # >= 2 grid steps -> both v7x TensorCores busy
    tm = max(8, min(tile_m, tm_budget, tm_half))
    n_pad = _round_up(N, tm)
    if n_pad != N:
        v = jnp.pad(v, ((0, n_pad - N), (0, 0), (0, 0)))
    grid = (n_pad // tm,)

    weight_bytes = 2 * ((8 + 3 * H + 8 + 8) * H * 4)       # resident weights, double-buffered
    vmem_limit = int(row_bytes * tm + weight_bytes + (16 << 20))   # + headroom for temporaries
    vmem_limit = int(min(max(vmem_limit, 32 << 20), 48 << 20))     # stay under v7x's 64 MiB

    def _resident(shape):
        # Same block index for every grid step -> stays resident in VMEM (no per-step DMA).
        return pl.BlockSpec(shape, lambda i: (0, 0))

    # TODO(synk): if production H is not a multiple of 128, pad H in the wrapper to keep the
    # output stores lane-dense (H=128 here already satisfies this).
    vout, s = pl.pallas_call(
        _vis_inter_kernel,
        out_shape=(
            jax.ShapeDtypeStruct((n_pad, 3, H), dtype),
            jax.ShapeDtypeStruct((n_pad, H), dtype),
        ),
        grid=grid,
        in_specs=[
            pl.BlockSpec((tm, 3, H), lambda i: (i, 0, 0)),
            _resident((3, H)),
            _resident((2 * H, H)),
            _resident((H, H)),
            _resident((3, H)),
            _resident((1, H)),
        ],
        out_specs=[
            pl.BlockSpec((tm, 3, H), lambda i: (i, 0, 0)),
            pl.BlockSpec((tm, H), lambda i: (i, 0)),
        ],
        compiler_params=pltpu.CompilerParams(
            dimension_semantics=("parallel",),   # independent node tiles -> both TCs on v7x
            vmem_limit_bytes=vmem_limit,
        ),
    )(v, wc, wab, wwt_c, const, nbs)

    if n_pad != N:
        vout = vout[:N]
        s = s[:N]
    return vout, s


# ----------------------------- pure-JAX reference -----------------------------
def _linear_bias_small_ref(xx, w, b, bias_norm=1e-6):
    nrm = jnp.sqrt(jnp.sum(b * b, axis=1) + 1e-8)      # (out,)
    nrm = jnp.maximum(nrm, bias_norm)
    nb = b / nrm[:, None]                              # (out, 3)
    return jnp.matmul(xx, w.T) + jnp.transpose(nb)[None, :, :]


def _vis_inter_action_ref(v, params, bias_norm=1e-6):
    wc = params["w_cross"]                             # (1, 3, H)
    cross = jnp.cross(v, jnp.broadcast_to(wc, v.shape), axis=1)
    vout_1 = _linear_bias_small_ref(cross, params["w_w"], params["b_w"], bias_norm)
    s = _linear_bias_small_ref(v, params["w_w"], params["b_w"], bias_norm).sum(axis=1)
    vout_2 = _linear_bias_small_ref(v, params["w_1"], params["b_1"], bias_norm)
    v_out = _linear_bias_small_ref(jnp.concatenate([vout_1, vout_2], axis=2),
                                   params["w_2"], params["b_2"], bias_norm)
    return v_out, s


if __name__ == "__main__":
    key = jax.random.PRNGKey(0)
    N, H = 64, 128
    ks = jax.random.split(key, 9)
    x = jax.random.normal(ks[0], (N, H), jnp.float32)
    v = jax.random.normal(ks[1], (N, 3, H), jnp.float32)
    params = {
        "w_cross": 0.2 * jax.random.normal(ks[2], (1, 3, H), jnp.float32),
        "w_w": jax.random.normal(ks[3], (H, H), jnp.float32) * (H ** -0.5),
        "b_w": 0.3 * jax.random.normal(ks[4], (H, 3), jnp.float32),
        "w_1": jax.random.normal(ks[5], (H, H), jnp.float32) * (H ** -0.5),
        "b_1": 0.3 * jax.random.normal(ks[6], (H, 3), jnp.float32),
        "w_2": jax.random.normal(ks[7], (H, 2 * H), jnp.float32) * ((2 * H) ** -0.5),
        "b_2": 0.3 * jax.random.normal(ks[8], (H, 3), jnp.float32),
    }

    v_out, s = vis_inter_action(x, v, params)
    v_out, s = jax.block_until_ready((v_out, s))

    ref_v_out, ref_s = _vis_inter_action_ref(v, params)
    assert v_out.shape == (N, 3, H) and s.shape == (N, H)
    assert bool(jnp.allclose(v_out, ref_v_out, atol=2e-2, rtol=2e-2)), "v_out mismatch vs reference"
    assert bool(jnp.allclose(s, ref_s, atol=2e-2, rtol=2e-2)), "s mismatch vs reference"

    print("KERNEL_OK")
</pallas_src>

<mosaic_0001>
module attributes {stable_mosaic.version = 11 : i64} {
  func.func @_vis_inter_kernel(%arg0: i32, %arg1: memref<32x3x128xf32, #tpu.memory_space<vmem>>, %arg2: memref<3x128xf32, #tpu.memory_space<vmem>>, %arg3: memref<256x128xf32, #tpu.memory_space<vmem>>, %arg4: memref<128x128xf32, #tpu.memory_space<vmem>>, %arg5: memref<3x128xf32, #tpu.memory_space<vmem>>, %arg6: memref<1x128xf32, #tpu.memory_space<vmem>>, %arg7: memref<32x3x128xf32, #tpu.memory_space<vmem>>, %arg8: memref<32x128xf32, #tpu.memory_space<vmem>>) attributes {dimension_semantics = [#tpu.dimension_semantics<parallel>], iteration_bounds = array<i64: 2>, scalar_prefetch = 0 : i64, scratch_operands = 0 : i64, tpu.core_type = #tpu.core_type<tc>, window_params = [{transform_indices = @transform_0, window_bounds = array<i64: 32, 3, 128>}, {pipeline_mode = #tpu.pipeline_mode<synchronous>, transform_indices = @transform_1, window_bounds = array<i64: 3, 128>}, {pipeline_mode = #tpu.pipeline_mode<synchronous>, transform_indices = @transform_2, window_bounds = array<i64: 256, 128>}, {pipeline_mode = #tpu.pipeline_mode<synchronous>, transform_indices = @transform_3, window_bounds = array<i64: 128, 128>}, {pipeline_mode = #tpu.pipeline_mode<synchronous>, transform_indices = @transform_4, window_bounds = array<i64: 3, 128>}, {pipeline_mode = #tpu.pipeline_mode<synchronous>, transform_indices = @transform_5, window_bounds = array<i64: 1, 128>}, {transform_indices = @transform_6, window_bounds = array<i64: 32, 3, 128>}, {transform_indices = @transform_7, window_bounds = array<i64: 32, 128>}]} {
    %c0 = arith.constant 0 : index
    %c0_0 = arith.constant 0 : index
    %c0_1 = arith.constant 0 : index
    %0 = vector.load %arg1[%c0, %c0_0, %c0_1] : memref<32x3x128xf32, #tpu.memory_space<vmem>>, vector<32x3x128xf32>
    %1 = vector.extract_strided_slice %0 {offsets = [0, 0, 0], sizes = [32, 1, 128], strides = [1, 1, 1]} : vector<32x3x128xf32> to vector<32x1x128xf32>
    %2 = vector.shape_cast %1 : vector<32x1x128xf32> to vector<32x128xf32>
    %3 = vector.extract_strided_slice %0 {offsets = [0, 1, 0], sizes = [32, 1, 128], strides = [1, 1, 1]} : vector<32x3x128xf32> to vector<32x1x128xf32>
    %4 = vector.shape_cast %3 : vector<32x1x128xf32> to vector<32x128xf32>
    %5 = vector.extract_strided_slice %0 {offsets = [0, 2, 0], sizes = [32, 1, 128], strides = [1, 1, 1]} : vector<32x3x128xf32> to vector<32x1x128xf32>
    %6 = vector.shape_cast %5 : vector<32x1x128xf32> to vector<32x128xf32>
    %c0_2 = arith.constant 0 : index
    %c0_3 = arith.constant 0 : index
    %7 = vector.load %arg2[%c0_2, %c0_3] : memref<3x128xf32, #tpu.memory_space<vmem>>, vector<3x128xf32>
    %8 = vector.extract_strided_slice %7 {offsets = [0, 0], sizes = [1, 128], strides = [1, 1]} : vector<3x128xf32> to vector<1x128xf32>
    %9 = vector.extract_strided_slice %7 {offsets = [1, 0], sizes = [1, 128], strides = [1, 1]} : vector<3x128xf32> to vector<1x128xf32>
    %10 = vector.extract_strided_slice %7 {offsets = [2, 0], sizes = [1, 128], strides = [1, 1]} : vector<3x128xf32> to vector<1x128xf32>
    %11 = vector.broadcast %10 : vector<1x128xf32> to vector<32x128xf32>
    %12 = arith.mulf %4, %11 : vector<32x128xf32>
    %13 = vector.broadcast %9 : vector<1x128xf32> to vector<32x128xf32>
    %14 = arith.mulf %6, %13 : vector<32x128xf32>
    %15 = arith.subf %12, %14 : vector<32x128xf32>
    %16 = vector.broadcast %8 : vector<1x128xf32> to vector<32x128xf32>
    %17 = arith.mulf %6, %16 : vector<32x128xf32>
    %18 = vector.broadcast %10 : vector<1x128xf32> to vector<32x128xf32>
    %19 = arith.mulf %2, %18 : vector<32x128xf32>
    %20 = arith.subf %17, %19 : vector<32x128xf32>
    %21 = vector.broadcast %9 : vector<1x128xf32> to vector<32x128xf32>
    %22 = arith.mulf %2, %21 : vector<32x128xf32>
    %23 = vector.broadcast %8 : vector<1x128xf32> to vector<32x128xf32>
    %24 = arith.mulf %4, %23 : vector<32x128xf32>
    %25 = arith.subf %22, %24 : vector<32x128xf32>
    %c0_4 = arith.constant 0 : index
    %c0_5 = arith.constant 0 : index
    %26 = vector.load %arg3[%c0_4, %c0_5] : memref<256x128xf32, #tpu.memory_space<vmem>>, vector<256x128xf32>
    %c0_6 = arith.constant 0 : index
    %c0_7 = arith.constant 0 : index
    %27 = vector.load %arg5[%c0_6, %c0_7] : memref<3x128xf32, #tpu.memory_space<vmem>>, vector<3x128xf32>
    %28 = tpu.concatenate %15, %2 in 1 : vector<32x128xf32>, vector<32x128xf32> -> vector<32x256xf32>
    %cst = arith.constant dense<0.000000e+00> : vector<32x128xf32>
    %29 = tpu.matmul %28, %26, %cst {dimension_numbers = #tpu.dot_dimension_numbers<[1], [0], [0], [1], [0, 0, 1, 1], [], []>} : vector<32x256xf32>, vector<256x128xf32>, vector<32x128xf32> -> vector<32x128xf32>
    %30 = vector.extract_strided_slice %27 {offsets = [0, 0], sizes = [1, 128], strides = [1, 1]} : vector<3x128xf32> to vector<1x128xf32>
    %31 = vector.broadcast %30 : vector<1x128xf32> to vector<32x128xf32>
    %32 = arith.addf %29, %31 : vector<32x128xf32>
    %33 = tpu.concatenate %20, %4 in 1 : vector<32x128xf32>, vector<32x128xf32> -> vector<32x256xf32>
    %cst_8 = arith.constant dense<0.000000e+00> : vector<32x128xf32>
    %34 = tpu.matmul %33, %26, %cst_8 {dimension_numbers = #tpu.dot_dimension_numbers<[1], [0], [0], [1], [0, 0, 1, 1], [], []>} : vector<32x256xf32>, vector<256x128xf32>, vector<32x128xf32> -> vector<32x128xf32>
    %35 = vector.extract_strided_slice %27 {offsets = [1, 0], sizes = [1, 128], strides = [1, 1]} : vector<3x128xf32> to vector<1x128xf32>
    %36 = vector.broadcast %35 : vector<1x128xf32> to vector<32x128xf32>
    %37 = arith.addf %34, %36 : vector<32x128xf32>
    %38 = tpu.concatenate %25, %6 in 1 : vector<32x128xf32>, vector<32x128xf32> -> vector<32x256xf32>
    %cst_9 = arith.constant dense<0.000000e+00> : vector<32x128xf32>
    %39 = tpu.matmul %38, %26, %cst_9 {dimension_numbers = #tpu.dot_dimension_numbers<[1], [0], [0], [1], [0, 0, 1, 1], [], []>} : vector<32x256xf32>, vector<256x128xf32>, vector<32x128xf32> -> vector<32x128xf32>
    %40 = vector.extract_strided_slice %27 {offsets = [2, 0], sizes = [1, 128], strides = [1, 1]} : vector<3x128xf32> to vector<1x128xf32>
    %41 = vector.broadcast %40 : vector<1x128xf32> to vector<32x128xf32>
    %42 = arith.addf %39, %41 : vector<32x128xf32>
    %c0_10 = arith.constant 0 : index
    %c0_11 = arith.constant 0 : index
    %c0_12 = arith.constant 0 : index
    %43 = vector.load %arg7[%c0_10, %c0_11, %c0_12] : memref<32x3x128xf32, #tpu.memory_space<vmem>>, vector<32x1x128xf32>
    %44 = vector.shape_cast %43 : vector<32x1x128xf32> to vector<32x128xf32>
    %45 = vector.shape_cast %32 : vector<32x128xf32> to vector<32x1x128xf32>
    tpu.vector_store %arg7[%c0_10, %c0_11, %c0_12], %45 {strides = array<i32>} : memref<32x3x128xf32, #tpu.memory_space<vmem>>, vector<32x1x128xf32>,
    %c0_13 = arith.constant 0 : index
    %c1 = arith.constant 1 : index
    %c0_14 = arith.constant 0 : index
    %46 = vector.load %arg7[%c0_13, %c1, %c0_14] : memref<32x3x128xf32, #tpu.memory_space<vmem>>, vector<32x1x128xf32>
    %47 = vector.shape_cast %46 : vector<32x1x128xf32> to vector<32x128xf32>
    %48 = vector.shape_cast %37 : vector<32x128xf32> to vector<32x1x128xf32>
    tpu.vector_store %arg7[%c0_13, %c1, %c0_14], %48 {strides = array<i32>} : memref<32x3x128xf32, #tpu.memory_space<vmem>>, vector<32x1x128xf32>,
    %c0_15 = arith.constant 0 : index
    %c2 = arith.constant 2 : index
    %c0_16 = arith.constant 0 : index
    %49 = vector.load %arg7[%c0_15, %c2, %c0_16] : memref<32x3x128xf32, #tpu.memory_space<vmem>>, vector<32x1x128xf32>
    %50 = vector.shape_cast %49 : vector<32x1x128xf32> to vector<32x128xf32>
    %51 = vector.shape_cast %42 : vector<32x128xf32> to vector<32x1x128xf32>
    tpu.vector_store %arg7[%c0_15, %c2, %c0_16], %51 {strides = array<i32>} : memref<32x3x128xf32, #tpu.memory_space<vmem>>, vector<32x1x128xf32>,
    %52 = arith.addf %2, %4 : vector<32x128xf32>
    %53 = arith.addf %52, %6 : vector<32x128xf32>
    %c0_17 = arith.constant 0 : index
    %c0_18 = arith.constant 0 : index
    %54 = vector.load %arg4[%c0_17, %c0_18] : memref<128x128xf32, #tpu.memory_space<vmem>>, vector<128x128xf32>
    %cst_19 = arith.constant dense<0.000000e+00> : vector<32x128xf32>
    %55 = tpu.matmul %53, %54, %cst_19 {dimension_numbers = #tpu.dot_dimension_numbers<[1], [0], [0], [1], [0, 0, 1, 1], [], []>} : vector<32x128xf32>, vector<128x128xf32>, vector<32x128xf32> -> vector<32x128xf32>
    %c0_20 = arith.constant 0 : index
    %c0_21 = arith.constant 0 : index
    %56 = vector.load %arg6[%c0_20, %c0_21] : memref<1x128xf32, #tpu.memory_space<vmem>>, vector<1x128xf32>
    %57 = vector.broadcast %56 : vector<1x128xf32> to vector<32x128xf32>
    %58 = arith.addf %55, %57 : vector<32x128xf32>
    %c0_22 = arith.constant 0 : index
    %c0_23 = arith.constant 0 : index
    %59 = vector.load %arg8[%c0_22, %c0_23] : memref<32x128xf32, #tpu.memory_space<vmem>>, vector<32x128xf32>
    tpu.vector_store %arg8[%c0_22, %c0_23], %58 {strides = array<i32>} : memref<32x128xf32, #tpu.memory_space<vmem>>, vector<32x128xf32>,
    return
  }
  func.func @transform_0(%arg0: i32) -> (i32, i32, i32) {
    %c0_i32 = arith.constant 0 : i32
    %c0_i32_0 = arith.constant 0 : i32
    %c0_i32_1 = arith.constant 0 : i32
    return %arg0, %c0_i32, %c0_i32_0 : i32, i32, i32
  }
  func.func @transform_1(%arg0: i32) -> (i32, i32) {
    %c0_i32 = arith.constant 0 : i32
    %c0_i32_0 = arith.constant 0 : i32
    %c0_i32_1 = arith.constant 0 : i32
    return %c0_i32, %c0_i32_0 : i32, i32
  }
  func.func @transform_2(%arg0: i32) -> (i32, i32) {
    %c0_i32 = arith.constant 0 : i32
    %c0_i32_0 = arith.constant 0 : i32
    %c0_i32_1 = arith.constant 0 : i32
    return %c0_i32, %c0_i32_0 : i32, i32
  }
  func.func @transform_3(%arg0: i32) -> (i32, i32) {
    %c0_i32 = arith.constant 0 : i32
    %c0_i32_0 = arith.constant 0 : i32
    %c0_i32_1 = arith.constant 0 : i32
    return %c0_i32, %c0_i32_0 : i32, i32
  }
  func.func @transform_4(%arg0: i32) -> (i32, i32) {
    %c0_i32 = arith.constant 0 : i32
    %c0_i32_0 = arith.constant 0 : i32
    %c0_i32_1 = arith.constant 0 : i32
    return %c0_i32, %c0_i32_0 : i32, i32
  }
  func.func @transform_5(%arg0: i32) -> (i32, i32) {
    %c0_i32 = arith.constant 0 : i32
    %c0_i32_0 = arith.constant 0 : i32
    %c0_i32_1 = arith.constant 0 : i32
    return %c0_i32, %c0_i32_0 : i32, i32
  }
  func.func @transform_6(%arg0: i32) -> (i32, i32, i32) {
    %c0_i32 = arith.constant 0 : i32
    %c0_i32_0 = arith.constant 0 : i32
    %c0_i32_1 = arith.constant 0 : i32
    return %arg0, %c0_i32, %c0_i32_0 : i32, i32, i32
  }
  func.func @transform_7(%arg0: i32) -> (i32, i32) {
    %c0_i32 = arith.constant 0 : i32
    %c0_i32_0 = arith.constant 0 : i32
    return %arg0, %c0_i32 : i32, i32
  }
}

</mosaic_0001>

<bundles_post_ra>
// kernel: tpu_custom_call.1
= control target key start
LH: loop header
LB: loop body
LE: loop exit
PB: predicated region body
PF: predicated region fallthrough
CT: control target
= control target key end

     0   :  { %13 = vsyncpa [#allocation3], 0  ;;  %s5290_s0 = inlined_call_operand.vmem [shape: f32[64,3,128], index: 0, kind: input, shape index: {}]   ;;  %s5291_s1 = inlined_call_operand.vmem [shape: f32[3,128], index: 1, kind: input, shape index: {}]   ;;  %s5292_s2 = inlined_call_operand.vmem [shape: f32[256,128], index: 2, kind: input, shape index: {}]   ;;  %s5293_s3 = inlined_call_operand.vmem [shape: f32[128,128], index: 3, kind: input, shape index: {}]   ;;  %s5294_s4 = inlined_call_operand.vmem [shape: f32[3,128], index: 4, kind: input, shape index: {}]   ;;  %s5295_s5 = inlined_call_operand.vmem [shape: f32[1,128], index: 5, kind: input, shape index: {}]   ;;  %s5296_s6 = inlined_call_operand.vmem [shape: f32[64,3,128], index: 6, kind: output, shape index: {0}]   ;;  %s5297_s7 = inlined_call_operand.hbm [shape: f32[64,128], index: 7, kind: output, shape index: {1}]  }
   0x1   :  { %15 = vsyncpa [#allocation3 + $0x1], 0  ;;  %s3465_s24 = smov 0   ;;  %s3467_s25 = smov 0  }
   0x2   :  { %s3469_s26 = smov 0   ;;  %s3471_s27 = smov 0  }
   0x3 LB: > { %s3486_s28 = sadd.s32 4294967295, %s3419_s27   ;;  %s2901_s29 = sadd.s32 4294967294, %s3419_s27   ;;  %s3419_s27 = sphi %s3471_s27, %s5648_s27   ;;  %s3415_s26 = sphi %s3469_s26, %s5647_s26   ;;  %s3411_s25 = sphi %s3467_s25, %s5646_s25   ;;  %s3407_s24 = sphi %s3465_s24, %s5645_s24  }
   0x4   : > { %s3490_s30 = sadd.s32 1, %s3419_s27   ;;  %s185_s8 = sadd.s32 1, %s3415_s26 }
   0x5   : > { %s182_s9 = ssub.s32 %s3419_s27, %s3490_s30  ;;  %p195_p0 = scmp.ne.s32.totalorder %s3415_s26, %s3411_s25 }
   0x6   : > { %p183_p1 = scmp.eq.s32.totalorder %s182_s9, 0  ;;  %p196_p2 = scmp.eq.s32.totalorder %s3486_s28, 1 }
   0x7   : > { %p201_p3 = scmp.ne.s32.totalorder %s3411_s25, %s3407_s24  ;;  %p202_p4 = scmp.eq.s32.totalorder %s2901_s29, 1 }
   0x8   : > { %s3501_s10 = scalar_select %p183_p1, %s3415_s26, %s185_s8  }
   0x9   : > { %p3503_p5 = por %p196_p2, %p195_p0  ;;  %p3507_p6 = por %p202_p4, %p201_p3 }
   0xa   : > { %p2904_p7 = scmp.ge.s32.totalorder %s3419_s27, 1  ;;  %p244_p8 = scmp.lt.s32.totalorder %s3419_s27, 3 }
   0xc   : > { %p245_p9 = pnand %p2904_p7, %p244_p8 }
   0xe   : > { %248 = sbr.rel (%p245_p9) target bundleno = 483 (0x1e3), region = 44 }
  0x15   : > { %v835_v0 = vld [vmem:[%s5292_s2 + $0x80] sm:$0xff]  ;;  %v836_v1 = vld [vmem:[%s5292_s2 + $0x88] sm:$0xff]  ;;  %s2906_s19 = sshll.u32 %s3486_s28, 5  ;;  %v837_v5 = vld [vmem:[%s5292_s2 + $0x90] sm:$0xff]  ;;  %v327_v14 = vlaneseq  ;;  %vm885_vm0 = vcmask 1042434   ;;  %vm888_vm1 = vcmask 1043459  }
  0x16   : > { %v819_v2 = vld [vmem:[%s5292_s2] sm:$0xff]  ;;  %v3523_v3 = vpack.c.bf16 %v836_v1, %v835_v0  ;;  %v820_v4 = vld [vmem:[%s5292_s2 + $0x8] sm:$0xff]  ;;  %v838_v6 = vld [vmem:[%s5292_s2 + $0x98] sm:$0xff]  ;;  %p282_p10 = scmp.lt.s32.totalorder %s2906_s19, 63  ;;  %vm891_vm2 = vcmask 1044484   ;;  %vm894_vm3 = vcmask 1045509  }
  0x17   : > { %v3534_v7 = vpack.c.bf16 %v820_v4, %v819_v2  ;;  %v3536_v8 = vpack.c.bf16 %v838_v6, %v837_v5  ;;  %v821_v9 = vld [vmem:[%s5292_s2 + $0x10] sm:$0xff]  ;;  %v822_v10 = vld [vmem:[%s5292_s2 + $0x18] sm:$0xff]  ;;  %v839_v11 = vld [vmem:[%s5292_s2 + $0xa0] sm:$0xff]  ;;  %v3591_v25 = vshrl.u32 %v327_v14, 7  ;;  %vm897_vm4 = vcmask 1046534   ;;  %s2965_s16 = sshll.u32 %s3486_s28, 9 }
  0x18   : > { %3157 = vmatprep.subr.bf16.mxu0 %v3523_v3  ;;  %v840_v12 = vld [vmem:[%s5292_s2 + $0xa8] sm:$0xff]  ;;  %3189 = vmatprep.subr.bf16.mxu1 %v3523_v3  ;;  %s5650_s19 = smov (!%p282_p10, %s2906_s19), 63  ;;  %v3555_v13 = vpack.c.bf16 %v822_v10, %v821_v9  ;;  %v823_v16 = vld [vmem:[%s5292_s2 + $0x20] sm:$0xff]  ;;  %v841_v18 = vld [vmem:[%s5292_s2 + $0xb0] sm:$0xff]  ;;  %vm903_vm5 = vcmask 1041409   ;;  %vm900_vm6 = vcmask 1047559  }
  0x19   : > { %5428 = vst [vmem:[#allocation5_spill] sm:$0xff] %v3536_v8  ;;  %3159 = vmatpush3.bf16.msra.mxu0 %v3534_v7  ;;  %3191 = vmatpush3.bf16.msra.mxu1 %v3534_v7  ;;  %v3559_v15 = vpack.c.bf16 %v840_v12, %v839_v11  ;;  %v824_v17 = vld [vmem:[%s5292_s2 + $0x28] sm:$0xff]  ;;  %v842_v19 = vld [vmem:[%s5292_s2 + $0xb8] sm:$0xff]  ;;  %v825_v20 = vld [vmem:[%s5292_s2 + $0x30] sm:$0xff]  ;;  %s2907_s17 = sshll.u32 %s5650_s19, 2  ;;  %v5298_v42 = vsub.s32 2, %v3591_v25 }
  0x1a   : > { %5429 = vst [vmem:[#allocation6_spill] sm:$0xff] %v3555_v13  ;;  %3161 = vmatprep.subr.bf16.mxu0 %v3536_v8  ;;  %3193 = vmatprep.subr.bf16.mxu1 %v3536_v8  ;;  %v3579_v21 = vpack.c.bf16 %v824_v17, %v823_v16  ;;  %v826_v22 = vld [vmem:[%s5292_s2 + $0x38] sm:$0xff]  ;;  %v843_v23 = vld [vmem:[%s5292_s2 + $0xc0] sm:$0xff]  ;;  %v844_v24 = vld [vmem:[%s5292_s2 + $0xc8] sm:$0xff]  ;;  %v3594_v26 = vpack.c.bf16 %v842_v19, %v841_v18  ;;  %s3626_s18 = scalar_lea.vmem %s5290_s0, %s2907_s17  ;;  %v5312_v43 = vsub.s32 1, %v3591_v25  ;;  %vm1037_vm7 = vcmask 1046528   ;;  %s5046_s8 = scalar_lea.vmem %s5296_s6, %s2907_s17 }
  0x1b   : > { %5430 = vst [vmem:[#allocation7_spill] sm:$0xff] %v3559_v15  ;;  %5432 = vst [vmem:[#allocation9_spill] sm:$0xff] %v3591_v25  ;;  %v827_v27 = vld [vmem:[%s5292_s2 + $0x40] sm:$0xff]  ;;  %v828_v28 = vld [vmem:[%s5292_s2 + $0x48] sm:$0xff]  ;;  %v3638_v38 = vpack.c.bf16 %v826_v22, %v825_v20  ;;  %v3654_v45 = vpack.c.bf16 %v844_v24, %v843_v23  ;;  %vm1267_vm8 = vcmask 1045504   ;;  %s278_s19 = sand.u32 1, %s3411_s25  }
  0x1c   : > { %5431 = vst [vmem:[#allocation8_spill] sm:$0xff] %v3579_v21  ;;  %5433 = vst [vmem:[#allocation10_spill] sm:$0xff] %v3594_v26  ;;  %v845_v29 = vld [vmem:[%s5292_s2 + $0xd0] sm:$0xff]  ;;  %v846_v30 = vld [vmem:[%s5292_s2 + $0xd8] sm:$0xff]  ;;  %v3669_v50 = vpack.c.bf16 %v828_v28, %v827_v27  ;;  %s2905_s17 = sshll.u32 %s278_s19, 5  ;;  %s5249_s22 = scalar_lea.sflag [#allocation3], %s278_s19 }
  0x1d   : > { %3163 = vmatpush3.bf16.msra.mxu0 %v3555_v13  ;;  %3195 = vmatpush3.bf16.msra.mxu1 %v3555_v13  ;;  %v829_v31 = vld [vmem:[%s5292_s2 + $0x50] sm:$0xff]  ;;  %v830_v32 = vld [vmem:[%s5292_s2 + $0x58] sm:$0xff]  ;;  %v847_v33 = vld [vmem:[%s5292_s2 + $0xe0] sm:$0xff]  ;;  %5434 = vst [vmem:[#allocation11_spill] sm:$0xff] %v3638_v38  ;;  %v3671_v51 = vpack.c.bf16 %v846_v30, %v845_v29  ;;  %s280_s14 = scalar_lea.vmem [#allocation2], %s2905_s17  ;;  %s3422_s28 = smov [#allocation2]  }
  0x1e   : > { %3165 = vmatprep.subr.bf16.mxu0 %v3559_v15  ;;  %3197 = vmatprep.subr.bf16.mxu1 %v3559_v15  ;;  %v848_v34 = vld [vmem:[%s5292_s2 + $0xe8] sm:$0xff]  ;;  %v831_v35 = vld [vmem:[%s5292_s2 + $0x60] sm:$0xff]  ;;  %v849_v37 = vld [vmem:[%s5292_s2 + $0xf0] sm:$0xff]  ;;  %5435 = vst [vmem:[#allocation12_spill] sm:$0xff] %v3654_v45  ;;  %v3673_v52 = vpack.c.bf16 %v830_v32, %v829_v31  ;;  %s2814_s15 = sshll.u32 %s280_s14, 4  ;;  %s3361_s29 = sshll.u32 %s3422_s28, 4  ;;  %s5242_s15 = int_to_ptr.vmem [resolvable:$true] %s2814_s15  ;;  %s3362_s29 = int_to_ptr.vmem [resolvable:$false] %s3361_s29 }
  0x1f   : > { %v832_v36 = vld [vmem:[%s5292_s2 + $0x68] sm:$0xff]  ;;  %v850_v39 = vld [vmem:[%s5292_s2 + $0xf8] sm:$0xff]  ;;  %v833_v40 = vld [vmem:[%s5292_s2 + $0x70] sm:$0xff]  ;;  %5436 = vst [vmem:[#allocation13_spill] sm:$0xff] %v3669_v50  ;;  %v3684_v56 = vpack.c.bf16 %v848_v34, %v847_v33  ;;  %s3357_s23 = scalar_lea.vmem %s5242_s15, 512  ;;  %p3364_p0 = scmp.lt.s32.totalorder %s5242_s15, %s3362_s29 }
  0x20   : > { %v834_v41 = vld [vmem:[%s5292_s2 + $0x78] sm:$0xff]  ;;  %v3658_v46 = vld [vmem:[%s3626_s18] sm:$0x7]  ;;  %v3661_v47 = vld [vmem:[%s3626_s18 + $0x4] sm:$0x7]  ;;  %5437 = vst [vmem:[#allocation14_spill] sm:$0xff] %v3671_v51  ;;  %v3686_v57 = vpack.c.bf16 %v832_v36, %v831_v35  ;;  %v3688_v58 = vpack.c.bf16 %v850_v39, %v849_v37  ;;  %p3358_p11 = scmp.ne.s32.totalorder %s5242_s15, %s3357_s23 }
  0x21   : > { %3167 = vmatpush3.bf16.msra.mxu0 %v3579_v21  ;;  %3199 = vmatpush3.bf16.msra.mxu1 %v3579_v21  ;;  %v3664_v48 = vld [vmem:[%s3626_s18 + $0x8] sm:$0x7]  ;;  %v3667_v49 = vld [vmem:[%s3626_s18 + $0xc] sm:$0x7]  ;;  %5438 = vst [vmem:[#allocation15_spill] sm:$0xff] %v3673_v52  ;;  %5441 = vst [vmem:[#allocation18_spill] sm:$0xff] %v3684_v56  ;;  %v3690_v59 = vpack.c.bf16 %v834_v41, %v833_v40 }
  0x22   : > { %3169 = vmatprep.subr.bf16.mxu0 %v3594_v26  ;;  %3201 = vmatprep.subr.bf16.mxu1 %v3594_v26  ;;  %v3676_v53 = vld [vmem:[%s3626_s18 + $0x10] sm:$0x7]  ;;  %v3679_v54 = vld [vmem:[%s3626_s18 + $0x14] sm:$0x7]  ;;  %v3682_v55 = vld [vmem:[%s3626_s18 + $0x18] sm:$0x7]  ;;  %p3359_p12 = pnand %p3358_p11, %p3503_p5 }
  0x23   : > { %5439 = vst [vmem:[#allocation16_spill] sm:$0xff] %v3679_v54  ;;  %5440 = vst [vmem:[#allocation17_spill] sm:$0xff] %v3682_v55  ;;  %v3693_v60 = vld [vmem:[%s3626_s18 + $0x20] sm:$0x7]  ;;  %v3696_v61 = vld [vmem:[%s3626_s18 + $0x24] sm:$0x7] }
  0x24   : > { %5442 = vst [vmem:[#allocation19_spill] sm:$0xff] %v3686_v57  ;;  %5443 = vst [vmem:[#allocation20_spill] sm:$0xff] %v3688_v58  ;;  %v3699_v62 = vld [vmem:[%s3626_s18 + $0x28] sm:$0x7]  ;;  %v3703_v63 = vld [vmem:[%s3626_s18 + $0x1c] sm:$0x7]  ;;  %p3360_p13 = pneg %p3359_p12 }
  0x25   : > { %5444 = vst [vmem:[#allocation21_spill] sm:$0xff] %v3690_v59  ;;  %3171 = vmatpush3.bf16.msra.mxu0 %v3638_v38  ;;  %5445 = vst [vmem:[#allocation22_spill] sm:$0xff] %v3703_v63  ;;  %v3706_v0 = vld [vmem:[%s3626_s18 + $0x2c] sm:$0x7]  ;;  %v5308_v1 = vrot.slane %v3658_v46, 7  ;;  %v5307_v2 = vrot.slane %v3661_v47, 6  ;;  %3203 = vmatpush3.bf16.msra.mxu1 %v3638_v38 }
  0x26   : > { %v5305_v4 = vrot.slane %v3664_v48, 5  ;;  %v5304_v5 = vrot.slane %v3667_v49, 4  ;;  %3173 = vmatprep.subr.bf16.mxu0 %v3654_v45  ;;  %v3715_v6 = vld [vmem:[%s3626_s18 + $0x30] sm:$0x7]  ;;  %v5302_v9 = vrot.slane %v3676_v53, 3  ;;  %v3719_v10 = vrot.slane %v3679_v54, 2  ;;  %3205 = vmatprep.subr.bf16.mxu1 %v3654_v45 }
  0x27   : > { %v3722_v11 = vrot.slane %v3682_v55, 1  ;;  %v5306_v12 = vrot.slane %v3693_v60, 7  ;;  %v3727_v14 = vld [vmem:[%s3626_s18 + $0x34] sm:$0x7]  ;;  %v980_v16 = vsel %vm885_vm0, %v5307_v2, %v5308_v1  ;;  %v5303_v17 = vrot.slane %v3696_v61, 6 }
  0x28   : > { %5446 = vst [vmem:[#allocation23_spill] sm:$0xff] %v3719_v10  ;;  %5448 = vst [vmem:[#allocation25_spill] sm:$0xff] %v3727_v14  ;;  %v5301_v18 = vrot.slane %v3699_v62, 5  ;;  %v5300_v19 = vrot.slane %v3706_v0, 4  ;;  %v3738_v20 = vld [vmem:[%s3626_s18 + $0x38] sm:$0x7]  ;;  %v982_v23 = vsel %vm888_vm1, %v5305_v4, %v980_v16 }
  0x29   : > { %5447 = vst [vmem:[#allocation24_spill] sm:$0xff] %v3722_v11  ;;  %v3741_v22 = vld [vmem:[%s3626_s18 + $0x40] sm:$0x7]  ;;  %v992_v24 = vsel %vm903_vm5, %v5306_v12, %v3703_v63  ;;  %v5299_v27 = vrot.slane %v3715_v6, 3  ;;  %v3752_v28 = vrot.slane %v3727_v14, 2  ;;  %3175 = vmatpush3.bf16.msra.mxu0 %v3669_v50  ;;  %v984_v29 = vsel %vm891_vm2, %v5304_v5, %v982_v23  ;;  %3207 = vmatpush3.bf16.msra.mxu1 %v3669_v50 }
  0x2a   : > { %v994_v30 = vsel %vm885_vm0, %v5303_v17, %v992_v24  ;;  %v1003_v31 = vrot.slane %v3738_v20, 1  ;;  %v1005_v32 = vrot.slane %v3741_v22, 7  ;;  %v326_v33 = vld [vmem:[%s5291_s1] sm:$0x7]  ;;  %3177 = vmatprep.subr.bf16.mxu0 %v3671_v51  ;;  %v3769_v34 = vld [vmem:[%s3626_s18 + $0x3c] sm:$0x7]  ;;  %v986_v35 = vsel %vm894_vm3, %v5302_v9, %v984_v29  ;;  %3209 = vmatprep.subr.bf16.mxu1 %v3671_v51 }
  0x2b   : > { %5449 = vst [vmem:[#allocation26_spill] sm:$0xff] %v3752_v28  ;;  %v996_v36 = vsel %vm888_vm1, %v5301_v18, %v994_v30  ;;  %v3780_v37 = vsel %vm903_vm5, %v3703_v63, %v3722_v11  ;;  %v3784_v39 = vrot.slane %v326_v33, %v5298_v42  ;;  %v988_v40 = vsel %vm897_vm4, %v3719_v10, %v986_v35 }
  0x2c   : > { %v998_v41 = vsel %vm891_vm2, %v5300_v19, %v996_v36  ;;  %v1248_v16 = vsel %vm903_vm5, %v3769_v34, %v1003_v31  ;;  %v3794_v23 = vadd.f32 %v1003_v31, %v3738_v20  ;;  %v990_v24 = vsel %vm900_vm6, %v3722_v11, %v988_v40 }
  0x2d   : > { %v1000_v29 = vsel %vm894_vm3, %v5299_v27, %v998_v41  ;;  %v3803_v30 = vsel %vm885_vm0, %v1005_v32, %v1248_v16  ;;  %v3807_v35 = vmul.f32 %v3784_v39, %v3658_v46  ;;  %3179 = vmatpush3.bf16.msra.mxu0 %v3673_v52  ;;  %v1041_v42 = vrot.slane %v990_v24, 1  ;;  %3211 = vmatpush3.bf16.msra.mxu1 %v3673_v52 }
  0x2e   : > { %5450 = vst [vmem:[#allocation27_spill] sm:$0xff] %v3794_v23  ;;  %5451 = vst [vmem:[#allocation28_spill] sm:$0xff] %v3803_v30  ;;  %v1002_v36 = vsel %vm897_vm4, %v3752_v28, %v1000_v29  ;;  %v3814_v40 = vmul.f32 %v3784_v39, %v3661_v47  ;;  %v3818_v41 = vmul.f32 %v3784_v39, %v3664_v48  ;;  %3181 = vmatprep.subr.bf16.mxu0 %v3684_v56  ;;  %v3884_v23 = vld [vmem:[%s3626_s18 + $0x44] sm:$0x7] }
  0x2f   : > { %v3823_v16 = vsel %vm900_vm6, %v1003_v31, %v1002_v36  ;;  %v3827_v27 = vmul.f32 %v3784_v39, %v3667_v49  ;;  %v3831_v24 = vmul.f32 %v3784_v39, %v3676_v53  ;;  %v3835_v29 = vmul.f32 %v3784_v39, %v3679_v54  ;;  %3213 = vmatprep.subr.bf16.mxu1 %v3684_v56 }
  0x30   : > { %v5310_v19 = vrot.slane %v3823_v16, 1  ;;  %v3840_v18 = vmul.f32 %v3784_v39, %v3682_v55  ;;  %v3844_v31 = vmul.f32 %v3784_v39, %v3703_v63  ;;  %v3848_v36 = vmul.f32 %v3784_v39, %v3693_v60 }
  0x31   : > { %v3853_v9 = vmul.f32 %v3784_v39, %v3696_v61  ;;  %v3857_v17 = vmul.f32 %v3784_v39, %v3699_v62  ;;  %v3861_v5 = vmul.f32 %v3784_v39, %v3706_v0  ;;  %v3865_v4 = vmul.f32 %v3784_v39, %v3715_v6  ;;  %3183 = vmatpush3.bf16.msra.mxu0 %v3686_v57 }
  0x32   : > { %v1043_v12 = vsel %vm1037_vm7, %v1041_v42, %v5310_v19  ;;  %v3873_v2 = vmul.f32 %v3784_v39, %v3727_v14  ;;  %v3877_v1 = vmul.f32 %v3784_v39, %v3738_v20  ;;  %v3881_v44 = vrot.slane %v326_v33, %v5312_v43  ;;  %3185 = vmatprep.subr.bf16.mxu0 %v3688_v58 }
  0x33   : > { %5452 = vst [vmem:[#allocation29_spill] sm:$0xff] %v3865_v4  ;;  %1128 = vmatprep.mubr.f32.mxu0 %v1043_v12  ;;  %v5455_v11 = vsub.s32 0, %v3591_v25  ;;  %v601_v19 = vrot.slane %v3840_v18, 6  ;;  %v3894_v30 = vsel %vm903_vm5, %v1005_v32, %v3769_v34  ;;  %3215 = vmatpush3.bf16.msra.mxu1 %v3686_v57 }
  0x34   : > { %5453 = vst [vmem:[#allocation30_spill] sm:$0xff] %v3873_v2  ;;  %5454 = vst [vmem:[#allocation31_spill] sm:$0xff] %v3881_v44  ;;  %v3899_v43 = vmul.f32 %v3881_v44, %v3658_v46  ;;  %v3903_v52 = vmul.f32 %v3881_v44, %v3661_v47  ;;  %v3911_v12 = vmul.f32 %v3881_v44, %v3667_v49  ;;  %3217 = vmatprep.subr.bf16.mxu1 %v3688_v58 }
  0x35   : > { %v3889_v42 = vrot.slane %v326_v33, %v5455_v11  ;;  %v3907_v11 = vmul.f32 %v3881_v44, %v3664_v48  ;;  %v3916_v32 = vmul.f32 %v3881_v44, %v3676_v53  ;;  %v3920_v33 = vmul.f32 %v3881_v44, %v3679_v54  ;;  %3187 = vmatpush3.bf16.msra.mxu0 %v3690_v59 }
  0x36   : > { %5456 = vst [vmem:[#allocation32_spill] sm:$0xff] %v3899_v43  ;;  %5457 = vst [vmem:[#allocation33_spill] sm:$0xff] %v3903_v52  ;;  %v3924_v56 = vmul.f32 %v3881_v44, %v3682_v55  ;;  %v3928_v25 = vmul.f32 %v3881_v44, %v3703_v63  ;;  %v3934_v57 = vmul.f32 %v3881_v44, %v3693_v60  ;;  %v431_v38 = vrot.slane %v3899_v43, 1 }
  0x37   : > { %5458 = vst [vmem:[#allocation34_spill] sm:$0xff] %v3907_v11  ;;  %5459 = vst [vmem:[#allocation35_spill] sm:$0xff] %v3911_v12  ;;  %v3938_v51 = vmul.f32 %v3881_v44, %v3696_v61  ;;  %v3942_v50 = vmul.f32 %v3881_v44, %v3699_v62  ;;  %v3946_v63 = vmul.f32 %v3881_v44, %v3706_v0  ;;  %3221 = vmatprep.subr.bf16.mxu0 %v3523_v3 }
  0x38   : > { %5460 = vst [vmem:[#allocation36_spill] sm:$0xff] %v3916_v32  ;;  %5461 = vst [vmem:[#allocation37_spill] sm:$0xff] %v3920_v33  ;;  %v3950_v58 = vmul.f32 %v3881_v44, %v3715_v6  ;;  %v3954_v54 = vmul.f32 %v3881_v44, %v3727_v14  ;;  %v3958_v45 = vmul.f32 %v3881_v44, %v3738_v20  ;;  %v432_v26 = vrot.slane %v3903_v52, 1 }
  0x39   : > { %5462 = vst [vmem:[#allocation38_spill] sm:$0xff] %v3924_v56  ;;  %5463 = vst [vmem:[#allocation39_spill] sm:$0xff] %v3928_v25  ;;  %v433_v21 = vrot.slane %v3907_v11, 1  ;;  %v434_v15 = vrot.slane %v3911_v12, 1  ;;  %v435_v13 = vrot.slane %v3916_v32, 1  ;;  %3219 = vmatpush3.bf16.msra.mxu1 %v3690_v59  ;;  %v436_v14 = vrot.slane %v3920_v33, 1 }
  0x3a   : > { %5464 = vst [vmem:[#allocation40_spill] sm:$0xff] %v3934_v57  ;;  %5465 = vst [vmem:[#allocation41_spill] sm:$0xff] %v3938_v51  ;;  %v437_v8 = vrot.slane %v3924_v56, 1  ;;  %v438_v44 = vrot.slane %v3928_v25, 1  ;;  %v439_v43 = vrot.slane %v3934_v57, 1  ;;  %v440_v3 = vrot.slane %v3938_v51, 1 }
  0x3b   : > { %5466 = vst [vmem:[#allocation42_spill] sm:$0xff] %v3942_v50  ;;  %5467 = vst [vmem:[#allocation43_spill] sm:$0xff] %v3946_v63  ;;  %v441_v52 = vrot.slane %v3942_v50, 1  ;;  %v442_v11 = vrot.slane %v3946_v63, 1  ;;  %v443_v12 = vrot.slane %v3950_v58, 1  ;;  %v444_v32 = vrot.slane %v3954_v54, 1 }
  0x3c   : > { %5468 = vst [vmem:[#allocation44_spill] sm:$0xff] %v3950_v58  ;;  %5469 = vst [vmem:[#allocation45_spill] sm:$0xff] %v3954_v54  ;;  %v445_v59 = vrot.slane %v3958_v45, 1  ;;  %v495_v33 = vsub.f32 %v3807_v35, %v431_v38  ;;  %v496_v56 = vsub.f32 %v3814_v40, %v432_v26  ;;  %v497_v25 = vsub.f32 %v3818_v41, %v433_v21 }
  0x3d   : > { %5470 = vst [vmem:[#allocation46_spill] sm:$0xff] %v3958_v45  ;;  %v498_v57 = vsub.f32 %v3827_v27, %v434_v15  ;;  %v499_v51 = vsub.f32 %v3831_v24, %v435_v13  ;;  %v500_v50 = vsub.f32 %v3835_v29, %v436_v14  ;;  %v501_v63 = vsub.f32 %v3840_v18, %v437_v8 }
  0x3e   : > { %v502_v58 = vsub.f32 %v3844_v31, %v438_v44  ;;  %v503_v54 = vsub.f32 %v3848_v36, %v439_v43  ;;  %v504_v45 = vsub.f32 %v3853_v9, %v440_v3  ;;  %v505_v38 = vsub.f32 %v3857_v17, %v441_v52 }
  0x3f   : > { %v506_v26 = vsub.f32 %v3861_v5, %v442_v11  ;;  %v507_v21 = vsub.f32 %v3865_v4, %v443_v12  ;;  %v508_v15 = vsub.f32 %v3873_v2, %v444_v32  ;;  %v509_v13 = vsub.f32 %v3877_v1, %v445_v59 }
  0x40   : > { %v3994_v14 = vmul.f32 %v3889_v42, %v3682_v55  ;;  %v3998_v8 = vmul.f32 %v3889_v42, %v3738_v20  ;;  %v609_v43 = vrot.slane %v3877_v1, 6  ;;  %v884_v44 = vrot.slane %v496_v56, 7 }
  0x41   : > { %v887_v52 = vrot.slane %v497_v25, 6  ;;  %v890_v18 = vrot.slane %v498_v57, 5  ;;  %v893_v11 = vrot.slane %v499_v51, 4  ;;  %v896_v59 = vrot.slane %v500_v50, 3 }
  0x42   : > { %5471 = vst [vmem:[#allocation47_spill] sm:$0xff] %v3998_v8  ;;  %v4002_v12 = vsub.f32 %v3994_v14, %v601_v19  ;;  %v4005_v32 = vsub.f32 %v3998_v8, %v609_v43  ;;  %v899_v3 = vrot.slane %v501_v63, 2  ;;  %v886_v55 = vsel %vm885_vm0, %v884_v44, %v495_v33  ;;  %v4031_v43 = vld [vmem:[%s3626_s18 + $0x54] sm:$0x7] }
  0x43   : > { %v902_v20 = vrot.slane %v502_v58, 1  ;;  %v905_v2 = vrot.slane %v504_v45, 7  ;;  %v907_v4 = vrot.slane %v505_v38, 6  ;;  %v889_v56 = vsel %vm888_vm1, %v887_v52, %v886_v55  ;;  %v4016_v55 = vld [vmem:[%s3626_s18 + $0x48] sm:$0x7]  ;;  %5474 = vst [vmem:[#allocation49_spill] sm:$0xff] %v4031_v43 }
  0x44   : > { %5472 = vst [vmem:[#allocation48_spill] sm:$0xff] %v4005_v32  ;;  %v909_v25 = vrot.slane %v506_v26, 5  ;;  %v911_v51 = vrot.slane %v507_v21, 4  ;;  %v913_v57 = vrot.slane %v508_v15, 3  ;;  %v892_v1 = vsel %vm891_vm2, %v890_v18, %v889_v56  ;;  %v4019_v38 = vld [vmem:[%s3626_s18 + $0x4c] sm:$0x7] }
  0x45   : > { %v904_v19 = vsel %vm903_vm5, %v503_v54, %v902_v20  ;;  %v915_v50 = vrot.slane %v509_v13, 2  ;;  %v895_v33 = vsel %vm894_vm3, %v893_v11, %v892_v1  ;;  %v5473_v26 = vrot.slane %v3884_v23, 6  ;;  %v4028_v13 = vld [vmem:[%s3626_s18 + $0x50] sm:$0x7]  ;;  %v4038_v11 = vld [vmem:[%s3626_s18 + $0x58] sm:$0x7] }
  0x46   : > { %v906_v45 = vsel %vm885_vm0, %v905_v2, %v904_v19  ;;  %v898_v54 = vsel %vm897_vm4, %v896_v59, %v895_v33  ;;  %v5355_v2 = vrot.slane %v4016_v55, 5  ;;  %v5354_v44 = vrot.slane %v4019_v38, 4  ;;  %5475 = vst [vmem:[#allocation50_spill] sm:$0xff] %v4038_v11 }
  0x47   : > { %v1008_v21 = vsel %vm885_vm0, %v5473_v26, %v3894_v30  ;;  %v908_v15 = vsel %vm888_vm1, %v907_v4, %v906_v45  ;;  %v901_v52 = vsel %vm900_vm6, %v899_v3, %v898_v54  ;;  %v5353_v30 = vrot.slane %v4028_v13, 3  ;;  %v2588_v54 = vld [vmem:[%s5293_s3 + $0x8] sm:$0xff] }
  0x48   : > { %v910_v18 = vsel %vm891_vm2, %v909_v25, %v908_v15  ;;  %v4042_v59 = vrot.slane %v4031_v43, 2  ;;  %v1038_v20 = vrot.slane %v901_v52, 1  ;;  %v1010_v56 = vsel %vm888_vm1, %v5355_v2, %v1008_v21  ;;  %v4053_v25 = vld [vmem:[%s3626_s18 + $0x5c] sm:$0x7] }
  0x49   : > { %v912_v4 = vsel %vm894_vm3, %v911_v51, %v910_v18  ;;  %v4049_v1 = vrot.slane %v4038_v11, 1  ;;  %5478 = vst [vmem:[#allocation53_spill] sm:$0xff] %v4053_v25  ;;  %v1012_v19 = vsel %vm891_vm2, %v5354_v44, %v1010_v56  ;;  %v5479_v33 = vrot.slane %v3658_v46, 7 }
  0x4a   : > { %5476 = vst [vmem:[#allocation51_spill] sm:$0xff] %v4042_v59  ;;  %v914_v3 = vsel %vm897_vm4, %v913_v57, %v912_v4  ;;  %v5480_v51 = vrot.slane %v3661_v47, 6  ;;  %v5481_v26 = vrot.slane %v3693_v60, 7  ;;  %v2587_v57 = vld [vmem:[%s5293_s3] sm:$0xff]  ;;  %v1014_v52 = vsel %vm894_vm3, %v5353_v30, %v1012_v19 }
  0x4b   : > { %5477 = vst [vmem:[#allocation52_spill] sm:$0xff] %v4049_v1  ;;  %v4074_v15 = vsel %vm900_vm6, %v915_v50, %v914_v3  ;;  %v4082_v18 = vsel %vm903_vm5, %v4053_v25, %v4049_v1  ;;  %v5484_v50 = vrot.slane %v3667_v49, 4  ;;  %v5485_v19 = vrot.slane %v3696_v61, 6 }
  0x4c   : > { %v1236_v45 = vsel %vm888_vm1, %v5480_v51, %v5479_v33  ;;  %v1242_v21 = vsel %vm885_vm0, %v5481_v26, %v3780_v37  ;;  %5482 = vst [vmem:[#allocation54_spill] sm:$0xff] %v4082_v18  ;;  %v5483_v37 = vrot.slane %v3664_v48, 5  ;;  %v5357_v56 = vrot.slane %v4074_v15, 1 }
  0x4d   : > { %v1016_v33 = vsel %vm897_vm4, %v4042_v59, %v1014_v52  ;;  %v1243_v51 = vsel %vm888_vm1, %v5485_v19, %v1242_v21  ;;  %v5486_v58 = vrot.slane %v3676_v53, 3  ;;  %v4106_v30 = vpack.c.bf16 %v2588_v54, %v2587_v57  ;;  %v5507_v59 = vld [vmem:[#allocation8_spill] sm:$0xff] }
  0x4e   : > { %v1237_v4 = vsel %vm891_vm2, %v5483_v37, %v1236_v45  ;;  %v4098_v26 = vsel %vm900_vm6, %v4049_v1, %v1016_v33  ;;  %v5487_v37 = vrot.slane %v3699_v62, 5  ;;  %v4127_v54 = vmul.f32 %v3784_v39, %v3741_v22 }
  0x4f   : > { %v1238_v3 = vsel %vm894_vm3, %v5484_v50, %v1237_v4  ;;  %v1040_v4 = vsel %vm1037_vm7, %v1038_v20, %v5357_v56  ;;  %v5356_v21 = vrot.slane %v4098_v26, 1  ;;  %v5488_v50 = vrot.slane %v3706_v0, 4  ;;  %3253 = vmatprep.subr.bf16.mxu1 %v4106_v30  ;;  %v5503_v56 = vld [vmem:[#allocation6_spill] sm:$0xff] }
  0x50   : > { %v1239_v45 = vsel %vm897_vm4, %v5486_v58, %v1238_v3  ;;  %v1244_v52 = vsel %vm891_vm2, %v5487_v37, %v1243_v51  ;;  %1129 = vmatmul.mubr.f32.vlgmr.msra.gmra.mrb[0].mxu0 %v1040_v4  ;;  %v5489_v58 = vrot.slane %v3715_v6, 3  ;;  %v4123_v20 = vmul.f32 %v3784_v39, %v3769_v34 }
  0x51   : > { %v1240_v33 = vsel %vm900_vm6, %v3719_v10, %v1239_v45  ;;  %v1245_v19 = vsel %vm894_vm3, %v5488_v50, %v1244_v52  ;;  %3223 = vmatpush3.bf16.msra.mxu0 %v3534_v7  ;;  %v5490_v51 = vrot.slane %v3823_v16, 1  ;;  %v4141_v52 = vmul.f32 %v3784_v39, %v3884_v23  ;;  %v5506_v10 = vld [vmem:[#allocation7_spill] sm:$0xff] }
  0x52   : > { %v1246_v3 = vsel %vm897_vm4, %v5489_v58, %v1245_v19  ;;  %v1271_v57 = vrot.slane %v1240_v33, 2  ;;  %v4145_v4 = vmul.f32 %v3784_v39, %v4016_v55  ;;  %v5493_v33 = vld [vmem:[#allocation5_spill] sm:$0xff]  ;;  %v4151_v16 = vmul.f32 %v3784_v39, %v4019_v38 }
  0x53   : > { %v1047_v45 = vsel %vm1037_vm7, %v5490_v51, %v5356_v21  ;;  %v4137_v37 = vsel %vm900_vm6, %v3752_v28, %v1246_v3  ;;  %5492 = vst [vmem:[#allocation56_spill] sm:$0xff] %v4141_v52  ;;  %3225 = vmatprep.subr.bf16.mxu0 %v5493_v33  ;;  %v4155_v50 = vmul.f32 %v3784_v39, %v4028_v13  ;;  %v5496_v3 = vld [vmem:[#allocation31_spill] sm:$0xff] }
  0x54   : > { %5491 = vst [vmem:[#allocation55_spill] sm:$0xff] %v4137_v37  ;;  %1133 = vmatprep.mubr.f32.mxu0 %v1047_v45  ;;  %v5359_v7 = vrot.slane %v4137_v37, 2  ;;  %v4159_v19 = vmul.f32 %v3784_v39, %v4031_v43  ;;  %v353_v58 = vmul.f32 %v3784_v39, %v4038_v11  ;;  %v4165_v51 = vmul.f32 %v5496_v3, %v3769_v34 }
  0x55   : > { %5494 = vst [vmem:[#allocation5_spill] sm:$0xff] %v4155_v50  ;;  %v4169_v45 = vmul.f32 %v5496_v3, %v3741_v22  ;;  %v4173_v33 = vmul.f32 %v5496_v3, %v3884_v23  ;;  %v4180_v2 = vmul.f32 %v5496_v3, %v4016_v55  ;;  %v4184_v21 = vmul.f32 %v5496_v3, %v4019_v38 }
  0x56   : > { %5495 = vst [vmem:[#allocation57_spill] sm:$0xff] %v4159_v19  ;;  %5497 = vst [vmem:[#allocation31_spill] sm:$0xff] %v4165_v51  ;;  %v1273_v44 = vsel %vm1267_vm8, %v1271_v57, %v5359_v7  ;;  %v4188_v63 = vmul.f32 %v5496_v3, %v4028_v13  ;;  %3227 = vmatpush3.bf16.msra.mxu0 %v5503_v56  ;;  %v4193_v1 = vmul.f32 %v5496_v3, %v4031_v43 }
  0x57   : > { %5498 = vst [vmem:[#allocation58_spill] sm:$0xff] %v4169_v45  ;;  %5499 = vst [vmem:[#allocation59_spill] sm:$0xff] %v4173_v33  ;;  %1358 = vmatprep.mubr.f32.mxu1 %v1273_v44  ;;  %v4197_v57 = vmul.f32 %v5496_v3, %v4038_v11  ;;  %v446_v7 = vrot.slane %v4165_v51, 1  ;;  %v447_v28 = vrot.slane %v4169_v45, 1  ;;  %3229 = vmatprep.subr.bf16.mxu0 %v5506_v10  ;;  %v448_v18 = vrot.slane %v4173_v33, 1 }
  0x58   : > { %5500 = vst [vmem:[#allocation60_spill] sm:$0xff] %v4180_v2  ;;  %5501 = vst [vmem:[#allocation61_spill] sm:$0xff] %v4184_v21  ;;  %v449_v8 = vrot.slane %v4180_v2, 1  ;;  %v450_v44 = vrot.slane %v4184_v21, 1  ;;  %v451_v56 = vrot.slane %v4188_v63, 1  ;;  %v452_v32 = vrot.slane %v4193_v1, 1 }
  0x59   : > { %5502 = vst [vmem:[#allocation62_spill] sm:$0xff] %v4188_v63  ;;  %5504 = vst [vmem:[#allocation6_spill] sm:$0xff] %v4193_v1  ;;  %v453_v37 = vrot.slane %v4197_v57, 1  ;;  %v510_v43 = vsub.f32 %v4123_v20, %v446_v7  ;;  %v511_v51 = vsub.f32 %v4127_v54, %v447_v28  ;;  %v512_v45 = vsub.f32 %v4141_v52, %v448_v18  ;;  %v5509_v1 = vld [vmem:[#allocation10_spill] sm:$0xff] }
  0x5a   : > { %5505 = vst [vmem:[#allocation63_spill] sm:$0xff] %v4197_v57  ;;  %v513_v10 = vsub.f32 %v4145_v4, %v449_v8  ;;  %v514_v33 = vsub.f32 %v4151_v16, %v450_v44  ;;  %v515_v2 = vsub.f32 %v4155_v50, %v451_v56  ;;  %3231 = vmatpush3.bf16.msra.mxu0 %v5507_v59  ;;  %v617_v7 = vrot.slane %v353_v58, 6 }
  0x5b   : > { %v516_v63 = vsub.f32 %v4159_v19, %v452_v32  ;;  %v517_v21 = vsub.f32 %v353_v58, %v453_v37  ;;  %v4218_v57 = vmul.f32 %v3889_v42, %v4038_v11  ;;  %3233 = vmatprep.subr.bf16.mxu0 %v5509_v1  ;;  %v917_v28 = vrot.slane %v510_v43, 1  ;;  %v5511_v1 = vld [vmem:[#allocation11_spill] sm:$0xff] }
  0x5c   : > { %v919_v18 = vrot.slane %v512_v45, 7  ;;  %v921_v52 = vrot.slane %v513_v10, 6  ;;  %v923_v8 = vrot.slane %v514_v33, 5  ;;  %v925_v56 = vrot.slane %v515_v2, 4  ;;  %v5512_v45 = vld [vmem:[#allocation12_spill] sm:$0xff]  ;;  %v5522_v19 = vld [vmem:[#allocation15_spill] sm:$0xff] }
  0x5d   : > { %5508 = vst [vmem:[#allocation7_spill] sm:$0xff] %v4218_v57  ;;  %v4222_v44 = vsub.f32 %v4218_v57, %v617_v7  ;;  %v927_v50 = vrot.slane %v516_v63, 3  ;;  %v929_v59 = vrot.slane %v517_v21, 2  ;;  %v918_v32 = vsel %vm903_vm5, %v511_v51, %v917_v28  ;;  %v5513_v10 = vld [vmem:[#allocation16_spill] sm:$0xff]  ;;  %v5514_v28 = vld [vmem:[#allocation22_spill] sm:$0xff]  ;;  %v5515_v57 = vld [vmem:[#allocation25_spill] sm:$0xff] }
  0x5e   : > { %v4227_v37 = vmul.f32 %v3889_v42, %v3658_v46  ;;  %v4231_v58 = vmul.f32 %v3889_v42, %v3661_v47  ;;  %v4235_v43 = vmul.f32 %v3889_v42, %v3664_v48  ;;  %3235 = vmatpush3.bf16.msra.mxu0 %v5511_v1  ;;  %v920_v2 = vsel %vm885_vm0, %v919_v18, %v918_v32 }
  0x5f   : > { %5510 = vst [vmem:[#allocation8_spill] sm:$0xff] %v4222_v44  ;;  %v4242_v21 = vmul.f32 %v3889_v42, %v3667_v49  ;;  %v4246_v51 = vmul.f32 %v3889_v42, %v3676_v53  ;;  %3237 = vmatprep.subr.bf16.mxu0 %v5512_v45  ;;  %v922_v33 = vsel %vm888_vm1, %v921_v52, %v920_v2  ;;  %v596_v11 = vrot.slane %v3814_v40, 6 }
  0x60   : > { %v4252_v7 = vmul.f32 %v3889_v42, %v5513_v10  ;;  %v4256_v18 = vmul.f32 %v3889_v42, %v5514_v28  ;;  %v4260_v32 = vmul.f32 %v3889_v42, %v3693_v60  ;;  %v924_v1 = vsel %vm891_vm2, %v923_v8, %v922_v33  ;;  %v5517_v33 = vld [vmem:[#allocation13_spill] sm:$0xff] }
  0x61   : > { %v4265_v63 = vmul.f32 %v3889_v42, %v3696_v61  ;;  %v4269_v52 = vmul.f32 %v3889_v42, %v3699_v62  ;;  %v4273_v2 = vmul.f32 %v3889_v42, %v3706_v0  ;;  %v926_v45 = vsel %vm894_vm3, %v925_v56, %v924_v1 }
  0x62   : > { %v4278_v60 = vmul.f32 %v3889_v42, %v3715_v6  ;;  %v4282_v8 = vmul.f32 %v3889_v42, %v5515_v57  ;;  %v595_v61 = vrot.slane %v3807_v35, 6  ;;  %3239 = vmatpush3.bf16.msra.mxu0 %v5517_v33  ;;  %v928_v62 = vsel %vm897_vm4, %v927_v50, %v926_v45  ;;  %v5518_v35 = vld [vmem:[#allocation14_spill] sm:$0xff] }
  0x63   : > { %v597_v0 = vrot.slane %v3818_v41, 6  ;;  %v598_v56 = vrot.slane %v3827_v27, 6  ;;  %v4291_v1 = vsel %vm900_vm6, %v929_v59, %v928_v62  ;;  %v599_v6 = vrot.slane %v3831_v24, 6  ;;  %3241 = vmatprep.subr.bf16.mxu0 %v5518_v35  ;;  %v5519_v59 = vld [vmem:[#allocation29_spill] sm:$0xff]  ;;  %v5520_v62 = vld [vmem:[#allocation30_spill] sm:$0xff] }
  0x64   : > { %5516 = vst [vmem:[#allocation10_spill] sm:$0xff] %v4282_v8  ;;  %v600_v57 = vrot.slane %v3835_v29, 6  ;;  %v602_v44 = vrot.slane %v3844_v31, 6  ;;  %v5383_v33 = vrot.slane %v4291_v1, 1  ;;  %v603_v50 = vrot.slane %v3848_v36, 6 }
  0x65   : > { %v604_v40 = vrot.slane %v3853_v9, 6  ;;  %v605_v41 = vrot.slane %v3857_v17, 6  ;;  %v606_v27 = vrot.slane %v3861_v5, 6  ;;  %v607_v45 = vrot.slane %v5519_v59, 6 }
  0x66   : > { %v608_v24 = vrot.slane %v5520_v62, 6  ;;  %v659_v29 = vsub.f32 %v4227_v37, %v595_v61  ;;  %v5521_v31 = vrot.slane %v4074_v15, 1  ;;  %v660_v36 = vsub.f32 %v4231_v58, %v596_v11  ;;  %3243 = vmatpush3.bf16.msra.mxu0 %v5522_v19 }
  0x67   : > { %v661_v9 = vsub.f32 %v4235_v43, %v597_v0  ;;  %v662_v17 = vsub.f32 %v4242_v21, %v598_v56  ;;  %v663_v5 = vsub.f32 %v4246_v51, %v599_v6  ;;  %v664_v59 = vsub.f32 %v4252_v7, %v600_v57  ;;  %v5523_v56 = vld [vmem:[#allocation18_spill] sm:$0xff]  ;;  %v5525_v57 = vld [vmem:[#allocation20_spill] sm:$0xff] }
  0x68   : > { %v1045_v35 = vsel %vm1037_vm7, %v5521_v31, %v5383_v33  ;;  %v666_v61 = vsub.f32 %v4256_v18, %v602_v44  ;;  %v667_v62 = vsub.f32 %v4260_v32, %v603_v50  ;;  %v668_v15 = vsub.f32 %v4265_v63, %v604_v40  ;;  %3245 = vmatprep.subr.bf16.mxu0 %v5523_v56  ;;  %v4334_v40 = vld [vmem:[%s3626_s18 + $0x60] sm:$0x7] }
  0x69   : > { %1134 = vmatmul.mubr.f32.gmra.mrb[2].mxu0 %v1045_v35  ;;  %v669_v31 = vsub.f32 %v4269_v52, %v605_v41  ;;  %v670_v11 = vsub.f32 %v4273_v2, %v606_v27  ;;  %v671_v0 = vsub.f32 %v4278_v60, %v607_v45  ;;  %v672_v19 = vsub.f32 %v4282_v8, %v608_v24  ;;  %v5524_v35 = vld [vmem:[#allocation19_spill] sm:$0xff] }
  0x6a   : > { %v1181_v27 = vrot.slane %v660_v36, 7  ;;  %3247 = vmatpush3.bf16.msra.mxu0 %v5524_v35  ;;  %v1183_v45 = vrot.slane %v661_v9, 6  ;;  %v1185_v56 = vrot.slane %v662_v17, 5  ;;  %v1187_v24 = vrot.slane %v663_v5, 4  ;;  %5526 = vst [vmem:[#allocation11_spill] sm:$0xff] %v4334_v40 }
  0x6b   : > { %v1189_v33 = vrot.slane %v664_v59, 3  ;;  %3249 = vmatprep.subr.bf16.mxu0 %v5525_v57  ;;  %v1192_v6 = vrot.slane %v666_v61, 1  ;;  %v1195_v50 = vrot.slane %v668_v15, 7  ;;  %v1197_v8 = vrot.slane %v669_v31, 6  ;;  %v4338_v17 = vld [vmem:[%s3626_s18 + $0x64] sm:$0x7] }
  0x6c   : > { %v1182_v44 = vsel %vm888_vm1, %v1181_v27, %v659_v29  ;;  %v1199_v41 = vrot.slane %v670_v11, 5  ;;  %v1201_v35 = vrot.slane %v671_v0, 4  ;;  %v1203_v9 = vrot.slane %v672_v19, 3  ;;  %5527 = vst [vmem:[#allocation12_spill] sm:$0xff] %v4338_v17  ;;  %v4345_v61 = vld [vmem:[%s3626_s18 + $0x68] sm:$0x7] }
  0x6d   : > { %v1184_v36 = vsel %vm891_vm2, %v1183_v45, %v1182_v44  ;;  %v5528_v59 = vrot.slane %v4002_v12, 2  ;;  %5529 = vst [vmem:[#allocation16_spill] sm:$0xff] %v4345_v61  ;;  %v4348_v15 = vld [vmem:[%s3626_s18 + $0x6c] sm:$0x7]  ;;  %v5385_v31 = vrot.slane %v4334_v40, 7  ;;  %v5389_v57 = vrot.slane %v4338_v17, 6 }
  0x6e   : > { %v1186_v5 = vsel %vm894_vm3, %v1185_v56, %v1184_v36  ;;  %5530 = vst [vmem:[#allocation22_spill] sm:$0xff] %v4348_v15  ;;  %v5531_v11 = vld [vmem:[#allocation21_spill] sm:$0xff]  ;;  %v4356_v44 = vld [vmem:[%s3626_s18 + $0x70] sm:$0x7]  ;;  %v5388_v12 = vrot.slane %v4345_v61, 5  ;;  %v2590_v45 = vld [vmem:[%s5293_s3 + $0x18] sm:$0xff] }
  0x6f   : > { %v1193_v29 = vsel %vm903_vm5, %v1192_v6, %v5528_v59  ;;  %3251 = vmatpush3.bf16.msra.mxu0 %v5531_v11  ;;  %v1188_v0 = vsel %vm897_vm4, %v1187_v24, %v1186_v5  ;;  %5532 = vst [vmem:[#allocation25_spill] sm:$0xff] %v4356_v44  ;;  %v5387_v6 = vrot.slane %v4348_v15, 4  ;;  %v2589_v27 = vld [vmem:[%s5293_s3 + $0x10] sm:$0xff]  ;;  %v5386_v5 = vrot.slane %v4356_v44, 3  ;;  %v4378_v11 = vld [vmem:[%s3626_s18 + $0x78] sm:$0x7] }
  0x70   : > { %v1194_v19 = vsel %vm885_vm0, %v667_v62, %v1193_v29  ;;  %v1190_v56 = vsel %vm900_vm6, %v1189_v33, %v1188_v0  ;;  %v4369_v36 = vld [vmem:[%s3626_s18 + $0x74] sm:$0x7]  ;;  %v1020_v62 = vsel %vm903_vm5, %v5385_v31, %v4053_v25  ;;  %5534 = vst [vmem:[#allocation14_spill] sm:$0xff] %v4378_v11  ;;  %v4391_v31 = vrot.slane %v4378_v11, 1 }
  0x71   : > { %v1196_v24 = vsel %vm888_vm1, %v1195_v50, %v1194_v19  ;;  %5533 = vst [vmem:[#allocation13_spill] sm:$0xff] %v4369_v36  ;;  %v1268_v29 = vrot.slane %v1190_v56, 2  ;;  %v1022_v33 = vsel %vm885_vm0, %v5389_v57, %v1020_v62  ;;  %v4384_v50 = vrot.slane %v4369_v36, 2 }
  0x72   : > { %v1198_v59 = vsel %vm891_vm2, %v1197_v8, %v1196_v24  ;;  %v1024_v19 = vsel %vm888_vm1, %v5388_v12, %v1022_v33  ;;  %5536 = vst [vmem:[#allocation30_spill] sm:$0xff] %v4391_v31  ;;  %v3256_v8 = vpack.c.bf16 %v2590_v45, %v2589_v27  ;;  %v4399_v62 = vmul.f32 %v3784_v39, %v4053_v25 }
  0x73   : > { %5535 = vst [vmem:[#allocation29_spill] sm:$0xff] %v4384_v50  ;;  %v1200_v0 = vsel %vm894_vm3, %v1199_v41, %v1198_v59  ;;  %v1026_v24 = vsel %vm891_vm2, %v5387_v6, %v1024_v19  ;;  %v4403_v41 = vmul.f32 %v3784_v39, %v4334_v40  ;;  %v4417_v45 = vmul.f32 %v3784_v39, %v4345_v61 }
  0x74   : > { %v1202_v56 = vsel %vm897_vm4, %v1201_v35, %v1200_v0  ;;  %v1028_v27 = vsel %vm894_vm3, %v5386_v5, %v1026_v24  ;;  %v4413_v35 = vmul.f32 %v3784_v39, %v4338_v17  ;;  %v4428_v19 = vmul.f32 %v3784_v39, %v4356_v44 }
  0x75   : > { %v4406_v59 = vsel %vm900_vm6, %v1203_v9, %v1202_v56  ;;  %v1030_v0 = vsel %vm897_vm4, %v4384_v50, %v1028_v27  ;;  %v4424_v9 = vmul.f32 %v3784_v39, %v4348_v15  ;;  %v4434_v24 = vmul.f32 %v3784_v39, %v4369_v36 }
  0x76   : > { %v5394_v33 = vrot.slane %v4406_v59, 2  ;;  %5538 = vst [vmem:[#allocation18_spill] sm:$0xff] %v4428_v19  ;;  %v1032_v56 = vsel %vm900_vm6, %v4391_v31, %v1030_v0  ;;  %v4438_v5 = vmul.f32 %v3784_v39, %v4378_v11  ;;  %v4442_v27 = vmul.f32 %v5496_v3, %v4053_v25 }
  0x77   : > { %5537 = vst [vmem:[#allocation15_spill] sm:$0xff] %v4424_v9  ;;  %5539 = vst [vmem:[#allocation19_spill] sm:$0xff] %v4434_v24  ;;  %v1050_v12 = vrot.slane %v1032_v56, 1  ;;  %v4449_v0 = vmul.f32 %v5496_v3, %v4334_v40  ;;  %v4453_v57 = vmul.f32 %v5496_v3, %v4338_v17  ;;  %v4457_v31 = vmul.f32 %v5496_v3, %v4345_v61  ;;  %v4494_v40 = vld [vmem:[%s3626_s18 + $0x7c] sm:$0x7] }
  0x78   : > { %5540 = vst [vmem:[#allocation20_spill] sm:$0xff] %v4438_v5  ;;  %5541 = vst [vmem:[#allocation21_spill] sm:$0xff] %v4442_v27  ;;  %v1270_v6 = vsel %vm1267_vm8, %v1268_v29, %v5394_v33  ;;  %v4461_v50 = vmul.f32 %v5496_v3, %v4348_v15  ;;  %v4465_v29 = vmul.f32 %v5496_v3, %v4356_v44  ;;  %v454_v15 = vrot.slane %v4442_v27, 1 }
  0x79   : > { %5542 = vst [vmem:[#allocation64_spill] sm:$0xff] %v4449_v0  ;;  %5543 = vst [vmem:[#allocation65_spill] sm:$0xff] %v4453_v57  ;;  %1359 = vmatmul.mubr.f32.vlgmr.msra.gmra.mrb[0].mxu1 %v1270_v6  ;;  %v4469_v56 = vmul.f32 %v5496_v3, %v4369_v36  ;;  %v5548_v6 = vrot.slane %v4098_v26, 1  ;;  %v4477_v25 = vmul.f32 %v5496_v3, %v4378_v11  ;;  %v455_v44 = vrot.slane %v4449_v0, 1 }
  0x7a   : > { %5544 = vst [vmem:[#allocation66_spill] sm:$0xff] %v4457_v31  ;;  %5545 = vst [vmem:[#allocation67_spill] sm:$0xff] %v4461_v50  ;;  %3255 = vmatpush3.bf16.msra.mxu1 %v4106_v30  ;;  %v456_v36 = vrot.slane %v4453_v57, 1  ;;  %v457_v61 = vrot.slane %v4457_v31, 1  ;;  %v458_v30 = vrot.slane %v4461_v50, 1  ;;  %v459_v26 = vrot.slane %v4465_v29, 1 }
  0x7b   : > { %5546 = vst [vmem:[#allocation68_spill] sm:$0xff] %v4465_v29  ;;  %5547 = vst [vmem:[#allocation69_spill] sm:$0xff] %v4469_v56  ;;  %v1051_v33 = vsel %vm1037_vm7, %v5548_v6, %v1050_v12  ;;  %3257 = vmatprep.subr.bf16.mxu1 %v3256_v8  ;;  %v460_v6 = vrot.slane %v4469_v56, 1  ;;  %v461_v11 = vrot.slane %v4477_v25, 1  ;;  %v518_v17 = vsub.f32 %v4399_v62, %v454_v15 }
  0x7c   : > { %5549 = vst [vmem:[#allocation70_spill] sm:$0xff] %v4477_v25  ;;  %1138 = vmatprep.mubr.f32.mxu0 %v1051_v33  ;;  %v519_v27 = vsub.f32 %v4403_v41, %v455_v44  ;;  %v520_v0 = vsub.f32 %v4413_v35, %v456_v36  ;;  %v521_v33 = vsub.f32 %v4417_v45, %v457_v61  ;;  %v1054_v15 = vrot.slane %v4494_v40, 1  ;;  %v2591_v44 = vld [vmem:[%s5293_s3 + $0x20] sm:$0xff]  ;;  %v2592_v61 = vld [vmem:[%s5293_s3 + $0x28] sm:$0xff] }
  0x7d   : > { %v522_v57 = vsub.f32 %v4424_v9, %v458_v30  ;;  %v523_v31 = vsub.f32 %v4428_v19, %v459_v26  ;;  %v524_v29 = vsub.f32 %v4434_v24, %v460_v6  ;;  %v525_v56 = vsub.f32 %v4438_v5, %v461_v11  ;;  %v2593_v11 = vld [vmem:[%s5293_s3 + $0x30] sm:$0xff] }
  0x7e   : > { %v931_v50 = vrot.slane %v518_v17, 1  ;;  %3259 = vmatpush3.bf16.msra.mxu1 %v3256_v8  ;;  %v933_v36 = vrot.slane %v520_v0, 7  ;;  %v935_v30 = vrot.slane %v521_v33, 6  ;;  %v2594_v17 = vld [vmem:[%s5293_s3 + $0x38] sm:$0xff]  ;;  %v1055_v24 = vsel %vm1037_vm7, %v1050_v12, %v1054_v15 }
  0x7f   : > { %v937_v26 = vrot.slane %v522_v57, 5  ;;  %v939_v25 = vrot.slane %v523_v31, 4  ;;  %v941_v6 = vrot.slane %v524_v29, 3  ;;  %v943_v5 = vrot.slane %v525_v56, 2 }
  0x80   : > { %v932_v8 = vsel %vm903_vm5, %v519_v27, %v931_v50  ;;  %v4515_v0 = vadd.f32 %v1054_v15, %v4494_v40  ;;  %v3260_v31 = vpack.c.bf16 %v2592_v61, %v2591_v44  ;;  %v4519_v57 = vmul.f32 %v3784_v39, %v4494_v40 }
  0x81   : > { %v934_v19 = vsel %vm885_vm0, %v933_v36, %v932_v8  ;;  %v4524_v9 = vmul.f32 %v5496_v3, %v4494_v40  ;;  %v3264_v50 = vpack.c.bf16 %v2594_v17, %v2593_v11  ;;  %v5423_v27 = vrot.slane %v3658_v46, 2 }
  0x82   : > { %5550 = vst [vmem:[#allocation71_spill] sm:$0xff] %v4515_v0  ;;  %v936_v33 = vsel %vm888_vm1, %v935_v30, %v934_v19  ;;  %3261 = vmatprep.subr.bf16.mxu1 %v3260_v31  ;;  %v1472_v56 = vrot.slane %v3661_v47, 1  ;;  %v1475_v15 = vrot.slane %v3667_v49, 7  ;;  %v1477_v3 = vrot.slane %v3676_v53, 6  ;;  %v5551_v30 = vld [vmem:[#allocation17_spill] sm:$0xff] }
  0x83   : > { %v938_v12 = vsel %vm891_vm2, %v937_v26, %v936_v33  ;;  %v462_v19 = vrot.slane %v4524_v9, 1  ;;  %3263 = vmatpush3.bf16.msra.mxu1 %v3260_v31  ;;  %v1479_v44 = vrot.slane %v5513_v10, 5  ;;  %v1481_v26 = vrot.slane %v5551_v30, 4 }
  0x84   : > { %v940_v39 = vsel %vm894_vm3, %v939_v25, %v938_v12  ;;  %3265 = vmatprep.subr.bf16.mxu1 %v3264_v50  ;;  %v1473_v36 = vsel %vm903_vm5, %v1472_v56, %v5423_v27  ;;  %v1483_v49 = vrot.slane %v5514_v28, 3  ;;  %v4546_v10 = vadd.f32 %v1472_v56, %v3661_v47  ;;  %v5553_v12 = vld [vmem:[#allocation32_spill] sm:$0xff] }
  0x85   : > { %v942_v61 = vsel %vm897_vm4, %v941_v6, %v940_v39  ;;  %v526_v11 = vsub.f32 %v4519_v57, %v462_v19  ;;  %v1474_v53 = vsel %vm885_vm0, %v3664_v48, %v1473_v36  ;;  %v729_v6 = vrot.slane %v3994_v14, 1  ;;  %v5555_v19 = vld [vmem:[#allocation33_spill] sm:$0xff] }
  0x86   : > { %v944_v25 = vsel %vm900_vm6, %v943_v5, %v942_v61  ;;  %v1476_v8 = vsel %vm888_vm1, %v1475_v15, %v1474_v53  ;;  %v730_v31 = vrot.slane %v4256_v18, 1  ;;  %v5552_v5 = vrot.slane %v4227_v37, 1  ;;  %v5558_v61 = vld [vmem:[#allocation34_spill] sm:$0xff] }
  0x87   : > { %v1048_v17 = vrot.slane %v944_v25, 1  ;;  %v2910_v33 = vrot.slane %v526_v11, 2  ;;  %v1478_v28 = vsel %vm891_vm2, %v1477_v3, %v1476_v8  ;;  %3267 = vmatpush3.bf16.msra.mxu1 %v3264_v50  ;;  %v5554_v48 = vrot.slane %v4231_v58, 1  ;;  %v5560_v3 = vld [vmem:[#allocation35_spill] sm:$0xff] }
  0x88   : > { %v787_v39 = vsub.f32 %v5553_v12, %v5552_v5  ;;  %v5556_v56 = vrot.slane %v4291_v1, 1  ;;  %v1480_v14 = vsel %vm894_vm3, %v1479_v44, %v1478_v28  ;;  %v5557_v18 = vrot.slane %v4235_v43, 1  ;;  %v5562_v1 = vld [vmem:[#allocation36_spill] sm:$0xff]  ;;  %v5564_v44 = vld [vmem:[#allocation37_spill] sm:$0xff]  ;;  %v5565_v28 = vld [vmem:[#allocation38_spill] sm:$0xff] }
  0x89   : > { %v788_v47 = vsub.f32 %v5555_v19, %v5554_v48  ;;  %v5559_v50 = vrot.slane %v4242_v21, 1  ;;  %v1053_v30 = vsel %vm1037_vm7, %v1048_v17, %v2910_v33  ;;  %v1482_v58 = vsel %vm897_vm4, %v1481_v26, %v1480_v14  ;;  %v5566_v5 = vld [vmem:[#allocation39_spill] sm:$0xff]  ;;  %v2595_v26 = vld [vmem:[%s5293_s3 + $0x40] sm:$0xff] }
  0x8a   : > { %v1049_v15 = vsel %vm1037_vm7, %v5556_v56, %v1048_v17  ;;  %v789_v36 = vsub.f32 %v5558_v61, %v5557_v18  ;;  %v5561_v25 = vrot.slane %v4246_v51, 1  ;;  %v5563_v53 = vrot.slane %v4252_v7, 1  ;;  %v2596_v51 = vld [vmem:[%s5293_s3 + $0x48] sm:$0xff] }
  0x8b   : > { %v790_v37 = vsub.f32 %v5560_v3, %v5559_v50  ;;  %1139 = vmatmul.mubr.f32.gmra.mrb[4].mxu0 %v1049_v15  ;;  %v1484_v43 = vsel %vm900_vm6, %v1483_v49, %v1482_v58  ;;  %v793_v21 = vsub.f32 %v5565_v28, %v729_v6  ;;  %v794_v12 = vsub.f32 %v5566_v5, %v730_v31  ;;  %v5567_v6 = vld [vmem:[#allocation28_spill] sm:$0xff] }
  0x8c   : > { %v791_v11 = vsub.f32 %v5562_v1, %v5561_v25  ;;  %v792_v8 = vsub.f32 %v5564_v44, %v5563_v53  ;;  %1143 = vmatprep.mubr.f32.mxu0 %v1055_v24  ;;  %v1411_v48 = vrot.slane %v788_v47, 7  ;;  %v1413_v17 = vrot.slane %v789_v36, 6  ;;  %v5572_v44 = vld [vmem:[#allocation51_spill] sm:$0xff] }
  0x8d   : > { %v1415_v7 = vrot.slane %v790_v37, 5  ;;  %v1421_v49 = vrot.slane %v793_v21, 2  ;;  %v1423_v56 = vrot.slane %v794_v12, 1  ;;  %v5568_v31 = vrot.slane %v3884_v23, 6 }
  0x8e   : > { %v1417_v33 = vrot.slane %v791_v11, 4  ;;  %v1419_v19 = vrot.slane %v792_v8, 3  ;;  %v1412_v24 = vsel %vm903_vm5, %v1411_v48, %v787_v39  ;;  %v5569_v14 = vrot.slane %v4016_v55, 5 }
  0x8f   : > { %v1250_v47 = vsel %vm888_vm1, %v5568_v31, %v5567_v6  ;;  %1144 = vmatmul.mubr.f32.gmra.mrb[6].mxu0 %v1053_v30  ;;  %v1414_v15 = vsel %vm885_vm0, %v1413_v17, %v1412_v24  ;;  %v3268_v61 = vpack.c.bf16 %v2596_v51, %v2595_v26  ;;  %v4596_v36 = vmul.f32 %v3889_v42, %v3769_v34  ;;  %v5574_v51 = vld [vmem:[#allocation56_spill] sm:$0xff]  ;;  %v5577_v6 = vld [vmem:[#allocation5_spill] sm:$0xff] }
  0x90   : > { %v1251_v18 = vsel %vm891_vm2, %v5569_v14, %v1250_v47  ;;  %1599 = vmatprep.mubr.f32.mxu0 %v1484_v43  ;;  %v1416_v39 = vsel %vm888_vm1, %v1415_v7, %v1414_v15  ;;  %v5570_v50 = vrot.slane %v4019_v38, 4  ;;  %v4604_v37 = vmul.f32 %v3889_v42, %v3741_v22  ;;  %v5573_v43 = vld [vmem:[#allocation49_spill] sm:$0xff] }
  0x91   : > { %v4608_v30 = vmul.f32 %v3889_v42, %v3884_v23  ;;  %v1418_v58 = vsel %vm891_vm2, %v1417_v33, %v1416_v39  ;;  %v5571_v25 = vrot.slane %v4028_v13, 3  ;;  %3269 = vmatprep.subr.bf16.mxu1 %v3268_v61  ;;  %v4616_v11 = vmul.f32 %v3889_v42, %v4016_v55  ;;  %v5578_v31 = vld [vmem:[#allocation57_spill] sm:$0xff] }
  0x92   : > { %v1252_v3 = vsel %vm894_vm3, %v5570_v50, %v1251_v18  ;;  %v4620_v53 = vmul.f32 %v3889_v42, %v4019_v38  ;;  %v1420_v22 = vsel %vm894_vm3, %v1419_v19, %v1418_v58  ;;  %v4629_v8 = vmul.f32 %v3889_v42, %v4028_v13  ;;  %3271 = vmatpush3.bf16.msra.mxu1 %v3268_v61  ;;  %v5575_v19 = vld [vmem:[#allocation55_spill] sm:$0xff]  ;;  %v3326_v39 = vld [vmem:[%s3626_s18 + $0x20] sm:$0x7] }
  0x93   : > { %v1253_v1 = vsel %vm897_vm4, %v5571_v25, %v1252_v3  ;;  %v4633_v28 = vmul.f32 %v3889_v42, %v5573_v43  ;;  %v1422_v21 = vsel %vm897_vm4, %v1421_v49, %v1420_v22  ;;  %v610_v12 = vrot.slane %v4123_v20, 6 }
  0x94   : > { %v4625_v23 = vsel %vm900_vm6, %v5572_v44, %v1253_v1  ;;  %v611_v48 = vrot.slane %v4127_v54, 6  ;;  %v1424_v26 = vsel %vm900_vm6, %v1423_v56, %v1422_v21  ;;  %v612_v17 = vrot.slane %v5574_v51, 6  ;;  %v3327_v1 = vld [vmem:[%s3626_s18 + $0x24] sm:$0x7]  ;;  %v5579_v21 = vld [vmem:[#allocation48_spill] sm:$0xff] }
  0x95   : > { %v1276_v5 = vrot.slane %v4625_v23, 2  ;;  %v613_v7 = vrot.slane %v4145_v4, 6  ;;  %v614_v33 = vrot.slane %v4151_v16, 6  ;;  %1600 = vmatmul.mubr.f32.vlgmr.msra.gmra.mrb[8].mxu0 %v1424_v26  ;;  %v5576_v24 = vrot.slane %v5575_v19, 2 }
  0x96   : > { %v615_v20 = vrot.slane %v5577_v6, 6  ;;  %v616_v54 = vrot.slane %v5578_v31, 6  ;;  %v674_v56 = vsub.f32 %v4596_v36, %v610_v12  ;;  %v675_v47 = vsub.f32 %v4604_v37, %v611_v48  ;;  %v4673_v6 = vld [vmem:[%s3626_s18 + $0x34] sm:$0x7] }
  0x97   : > { %v1277_v49 = vsel %vm1267_vm8, %v5576_v24, %v1276_v5  ;;  %v676_v4 = vsub.f32 %v4608_v30, %v612_v17  ;;  %v677_v16 = vsub.f32 %v4616_v11, %v613_v7  ;;  %v678_v15 = vsub.f32 %v4620_v53, %v614_v33  ;;  %v4663_v17 = vld [vmem:[%s3626_s18 + $0x2c] sm:$0x7]  ;;  %v4669_v24 = vld [vmem:[%s3626_s18 + $0x30] sm:$0x7] }
  0x98   : > { %1363 = vmatprep.mubr.f32.mxu1 %v1277_v49  ;;  %v679_v14 = vsub.f32 %v4629_v8, %v615_v20  ;;  %v680_v18 = vsub.f32 %v4633_v28, %v616_v54  ;;  %v1206_v61 = vrot.slane %v674_v56, 1  ;;  %v1485_v50 = vrot.slane %v3326_v39, 2  ;;  %v4678_v54 = vld [vmem:[%s3626_s18 + $0x28] sm:$0x7] }
  0x99   : > { %v1209_v3 = vrot.slane %v676_v4, 7  ;;  %v1211_v58 = vrot.slane %v677_v16, 6  ;;  %v1213_v25 = vrot.slane %v678_v15, 5  ;;  %v1486_v22 = vrot.slane %v3327_v1, 1  ;;  %v4683_v4 = vld [vmem:[%s3626_s18 + $0x38] sm:$0x7] }
  0x9a   : > { %v5580_v12 = vrot.slane %v5579_v21, 2  ;;  %v1215_v26 = vrot.slane %v679_v14, 4  ;;  %v1217_v51 = vrot.slane %v680_v18, 3  ;;  %v1489_v7 = vrot.slane %v4663_v17, 7 }
  0x9b   : > { %v1487_v19 = vsel %vm903_vm5, %v1486_v22, %v1485_v50  ;;  %v1491_v49 = vrot.slane %v4669_v24, 6  ;;  %v1493_v20 = vrot.slane %v4673_v6, 5  ;;  %v1497_v16 = vrot.slane %v3769_v34, 3 }
  0x9c   : > { %v1207_v48 = vsel %vm903_vm5, %v1206_v61, %v5580_v12  ;;  %v1488_v56 = vsel %vm885_vm0, %v4678_v54, %v1487_v19  ;;  %v2418_v18 = vrot.slane %v3326_v39, 1  ;;  %v2476_v61 = vadd.f32 %v3327_v1, %v1486_v22 }
  0x9d   : > { %v1208_v33 = vsel %vm885_vm0, %v675_v47, %v1207_v48  ;;  %v1495_v47 = vrot.slane %v4683_v4, 4  ;;  %v1490_v14 = vsel %vm888_vm1, %v1489_v7, %v1488_v56  ;;  %v2505_v12 = vrot.slane %v3327_v1, 2 }
  0x9e   : > { %v1210_v31 = vsel %vm888_vm1, %v1209_v3, %v1208_v33  ;;  %v1492_v3 = vsel %vm891_vm2, %v1491_v49, %v1490_v14  ;;  %v731_v48 = vrot.slane %v4260_v32, 1  ;;  %v2475_v27 = vadd.f32 %v3326_v39, %v2418_v18  ;;  %v5581_v39 = vld [vmem:[#allocation10_spill] sm:$0xff] }
  0x9f   : > { %v1212_v15 = vsel %vm891_vm2, %v1211_v58, %v1210_v31  ;;  %v1494_v19 = vsel %vm894_vm3, %v1493_v20, %v1492_v3  ;;  %v732_v34 = vrot.slane %v4265_v63, 1  ;;  %v4699_v22 = vadd.f32 %v2505_v12, %v2476_v61  ;;  %v5582_v20 = vld [vmem:[#allocation47_spill] sm:$0xff]  ;;  %v5588_v61 = vld [vmem:[#allocation44_spill] sm:$0xff]  ;;  %v5589_v3 = vld [vmem:[#allocation45_spill] sm:$0xff] }
  0xa0   : > { %v1214_v21 = vsel %vm894_vm3, %v1213_v25, %v1212_v15  ;;  %v1496_v7 = vsel %vm897_vm4, %v1495_v47, %v1494_v19  ;;  %v733_v25 = vrot.slane %v4269_v52, 1  ;;  %v4704_v49 = vadd.f32 %v2475_v27, %v1485_v50  ;;  %v5585_v50 = vld [vmem:[#allocation41_spill] sm:$0xff]  ;;  %v5591_v19 = vld [vmem:[#allocation31_spill] sm:$0xff] }
  0xa1   : > { %v1216_v33 = vsel %vm897_vm4, %v1215_v26, %v1214_v21  ;;  %v1498_v32 = vsel %vm900_vm6, %v1497_v16, %v1496_v7  ;;  %v734_v26 = vrot.slane %v4273_v2, 1  ;;  %v735_v63 = vrot.slane %v4278_v60, 1  ;;  %v5584_v16 = vld [vmem:[#allocation40_spill] sm:$0xff]  ;;  %v5586_v2 = vld [vmem:[#allocation42_spill] sm:$0xff]  ;;  %v5587_v60 = vld [vmem:[#allocation43_spill] sm:$0xff] }
  0xa2   : > { %v4696_v58 = vsel %vm900_vm6, %v1217_v51, %v1216_v33  ;;  %1604 = vmatprep.mubr.f32.mxu0 %v1498_v32  ;;  %v736_v51 = vrot.slane %v5581_v39, 1  ;;  %v737_v31 = vrot.slane %v5582_v20, 1  ;;  %v738_v56 = vrot.slane %v4596_v36, 1  ;;  %v5590_v36 = vld [vmem:[#allocation46_spill] sm:$0xff] }
  0xa3   : > { %v5425_v1 = vrot.slane %v4696_v58, 2  ;;  %v5583_v52 = vrot.slane %v4406_v59, 2  ;;  %v795_v27 = vsub.f32 %v5584_v16, %v731_v48  ;;  %v796_v15 = vsub.f32 %v5585_v50, %v732_v34  ;;  %v2597_v59 = vld [vmem:[%s5293_s3 + $0x50] sm:$0xff]  ;;  %v2598_v48 = vld [vmem:[%s5293_s3 + $0x58] sm:$0xff]  ;;  %v5592_v32 = vld [vmem:[#allocation54_spill] sm:$0xff] }
  0xa4   : > { %v797_v14 = vsub.f32 %v5586_v2, %v733_v25  ;;  %v798_v18 = vsub.f32 %v5587_v60, %v734_v26  ;;  %v799_v21 = vsub.f32 %v5588_v61, %v735_v63  ;;  %v800_v12 = vsub.f32 %v5589_v3, %v736_v51  ;;  %v5593_v26 = vld [vmem:[#allocation11_spill] sm:$0xff]  ;;  %v5595_v50 = vld [vmem:[#allocation12_spill] sm:$0xff] }
  0xa5   : > { %v1275_v47 = vsel %vm1267_vm8, %v5583_v52, %v5425_v1  ;;  %v801_v33 = vsub.f32 %v5590_v36, %v737_v31  ;;  %v802_v34 = vsub.f32 %v5591_v19, %v738_v56  ;;  %v1425_v7 = vrot.slane %v796_v15, 7  ;;  %v5597_v15 = vld [vmem:[#allocation16_spill] sm:$0xff]  ;;  %v5599_v36 = vld [vmem:[#allocation53_spill] sm:$0xff] }
  0xa6   : > { %1364 = vmatmul.mubr.f32.gmra.mrb[2].mxu1 %v1275_v47  ;;  %v1427_v25 = vrot.slane %v797_v14, 6  ;;  %v5594_v39 = vrot.slane %v5593_v26, 7  ;;  %v1429_v51 = vrot.slane %v798_v18, 5  ;;  %v1431_v20 = vrot.slane %v799_v21, 4 }
  0xa7   : > { %v1433_v31 = vrot.slane %v800_v12, 3  ;;  %v1435_v52 = vrot.slane %v801_v33, 2  ;;  %v1426_v47 = vsel %vm903_vm5, %v1425_v7, %v795_v27  ;;  %v1437_v16 = vrot.slane %v802_v34, 1  ;;  %v5600_v12 = vld [vmem:[#allocation22_spill] sm:$0xff]  ;;  %v5602_v7 = vld [vmem:[#allocation25_spill] sm:$0xff] }
  0xa8   : > { %v1256_v63 = vsel %vm885_vm0, %v5594_v39, %v5592_v32  ;;  %v5596_v2 = vrot.slane %v5595_v50, 6  ;;  %v3272_v61 = vpack.c.bf16 %v2598_v48, %v2597_v59  ;;  %v1428_v56 = vsel %vm885_vm0, %v1427_v25, %v1426_v47  ;;  %v5604_v47 = vld [vmem:[#allocation29_spill] sm:$0xff] }
  0xa9   : > { %v5598_v14 = vrot.slane %v5597_v15, 5  ;;  %v4744_v18 = vmul.f32 %v3889_v42, %v5599_v36  ;;  %v4748_v21 = vmul.f32 %v3889_v42, %v5593_v26  ;;  %v1430_v27 = vsel %vm888_vm1, %v1429_v51, %v1428_v56 }
  0xaa   : > { %v1257_v60 = vsel %vm888_vm1, %v5596_v2, %v1256_v63  ;;  %v5601_v33 = vrot.slane %v5600_v12, 4  ;;  %3273 = vmatprep.subr.bf16.mxu1 %v3272_v61  ;;  %v4756_v48 = vmul.f32 %v3889_v42, %v5595_v50  ;;  %v4760_v19 = vmul.f32 %v3889_v42, %v5597_v15 }
  0xab   : > { %v1258_v3 = vsel %vm891_vm2, %v5598_v14, %v1257_v60  ;;  %v1432_v34 = vsel %vm891_vm2, %v1431_v20, %v1430_v27  ;;  %v5603_v25 = vrot.slane %v5602_v7, 3  ;;  %v4768_v39 = vmul.f32 %v3889_v42, %v5600_v12  ;;  %3275 = vmatpush3.bf16.msra.mxu1 %v3272_v61  ;;  %v5605_v20 = vld [vmem:[#allocation13_spill] sm:$0xff] }
  0xac   : > { %v1259_v59 = vsel %vm894_vm3, %v5601_v33, %v1258_v3  ;;  %v4772_v63 = vmul.f32 %v3889_v42, %v5602_v7  ;;  %v1434_v51 = vsel %vm894_vm3, %v1433_v31, %v1432_v34  ;;  %v4781_v60 = vmul.f32 %v3889_v42, %v5605_v20 }
  0xad   : > { %v1260_v32 = vsel %vm897_vm4, %v5603_v25, %v1259_v59  ;;  %v618_v56 = vrot.slane %v4399_v62, 6  ;;  %v1436_v14 = vsel %vm897_vm4, %v1435_v52, %v1434_v51  ;;  %v619_v27 = vrot.slane %v4403_v41, 6  ;;  %v5606_v59 = vld [vmem:[#allocation15_spill] sm:$0xff]  ;;  %v5607_v25 = vld [vmem:[#allocation18_spill] sm:$0xff] }
  0xae   : > { %v4777_v2 = vsel %vm900_vm6, %v5604_v47, %v1260_v32  ;;  %v620_v61 = vrot.slane %v4413_v35, 6  ;;  %v1438_v31 = vsel %vm900_vm6, %v1437_v16, %v1436_v14  ;;  %v621_v33 = vrot.slane %v4417_v45, 6  ;;  %v5608_v41 = vld [vmem:[#allocation19_spill] sm:$0xff] }
  0xaf   : > { %v5424_v3 = vrot.slane %v4777_v2, 2  ;;  %v622_v34 = vrot.slane %v5606_v59, 6  ;;  %v623_v32 = vrot.slane %v5607_v25, 6  ;;  %1605 = vmatmul.mubr.f32.gmra.mrb[10].mxu0 %v1438_v31  ;;  %v624_v52 = vrot.slane %v5608_v41, 6  ;;  %v4806_v25 = vld [vmem:[%s3626_s18 + $0x40] sm:$0x7] }
  0xb0   : > { %v682_v35 = vsub.f32 %v4744_v18, %v618_v56  ;;  %v683_v16 = vsub.f32 %v4748_v21, %v619_v27  ;;  %v684_v45 = vsub.f32 %v4756_v48, %v620_v61  ;;  %v685_v51 = vsub.f32 %v4760_v19, %v621_v33  ;;  %v4810_v41 = vld [vmem:[%s3626_s18 + $0x44] sm:$0x7]  ;;  %v5609_v33 = vld [vmem:[#allocation8_spill] sm:$0xff] }
  0xb1   : > { %v1281_v62 = vsel %vm1267_vm8, %v1276_v5, %v5424_v3  ;;  %v686_v14 = vsub.f32 %v4768_v39, %v622_v34  ;;  %v687_v31 = vsub.f32 %v4772_v63, %v623_v32  ;;  %v688_v59 = vsub.f32 %v4781_v60, %v624_v52 }
  0xb2   : > { %1368 = vmatprep.mubr.f32.mxu1 %v1281_v62  ;;  %v1220_v23 = vrot.slane %v682_v35, 1  ;;  %v1499_v5 = vrot.slane %v4806_v25, 2  ;;  %v1500_v56 = vrot.slane %v4810_v41, 1  ;;  %v1223_v27 = vrot.slane %v684_v45, 7 }
  0xb3   : > { %v1225_v62 = vrot.slane %v685_v51, 6  ;;  %v1227_v61 = vrot.slane %v686_v14, 5  ;;  %v1229_v29 = vrot.slane %v687_v31, 4  ;;  %v5610_v3 = vrot.slane %v5609_v33, 2  ;;  %v5611_v31 = vld [vmem:[#allocation50_spill] sm:$0xff] }
  0xb4   : > { %v1231_v32 = vrot.slane %v688_v59, 3  ;;  %v1501_v52 = vsel %vm903_vm5, %v1500_v56, %v1499_v5  ;;  %v1503_v35 = vrot.slane %v4019_v38, 7  ;;  %v1505_v45 = vrot.slane %v4028_v13, 6 }
  0xb5   : > { %v1221_v34 = vsel %vm903_vm5, %v1220_v23, %v5610_v3  ;;  %v1502_v0 = vsel %vm885_vm0, %v4016_v55, %v1501_v52  ;;  %v1507_v51 = vrot.slane %v5573_v43, 5  ;;  %v1509_v59 = vrot.slane %v5611_v31, 4  ;;  %v5612_v52 = vld [vmem:[#allocation7_spill] sm:$0xff]  ;;  %v5617_v31 = vld [vmem:[#allocation62_spill] sm:$0xff] }
  0xb6   : > { %v1222_v1 = vsel %vm885_vm0, %v683_v16, %v1221_v34  ;;  %v1504_v3 = vsel %vm888_vm1, %v1503_v35, %v1502_v0  ;;  %v1511_v23 = vrot.slane %v5599_v36, 3  ;;  %v4832_v16 = vadd.f32 %v4810_v41, %v1500_v56 }
  0xb7   : > { %v1224_v14 = vsel %vm888_vm1, %v1223_v27, %v1222_v1  ;;  %v1506_v38 = vsel %vm891_vm2, %v1505_v45, %v1504_v3  ;;  %v739_v55 = vrot.slane %v4604_v37, 1  ;;  %v740_v1 = vrot.slane %v4608_v30, 1  ;;  %v5616_v3 = vld [vmem:[#allocation61_spill] sm:$0xff] }
  0xb8   : > { %v1226_v33 = vsel %vm891_vm2, %v1225_v62, %v1224_v14  ;;  %v1508_v43 = vsel %vm894_vm3, %v1507_v51, %v1506_v38  ;;  %v741_v0 = vrot.slane %v4616_v11, 1  ;;  %v742_v62 = vrot.slane %v4620_v53, 1  ;;  %v5613_v11 = vld [vmem:[#allocation58_spill] sm:$0xff]  ;;  %v5614_v51 = vld [vmem:[#allocation59_spill] sm:$0xff]  ;;  %v5615_v14 = vld [vmem:[#allocation60_spill] sm:$0xff] }
  0xb9   : > { %v1228_v13 = vsel %vm894_vm3, %v1227_v61, %v1226_v33  ;;  %v1510_v36 = vsel %vm897_vm4, %v1509_v59, %v1508_v43  ;;  %v743_v34 = vrot.slane %v4629_v8, 1  ;;  %v744_v61 = vrot.slane %v4633_v28, 1  ;;  %v5621_v43 = vld [vmem:[#allocation21_spill] sm:$0xff] }
  0xba   : > { %v1230_v27 = vsel %vm897_vm4, %v1229_v29, %v1228_v13  ;;  %v1512_v37 = vsel %vm900_vm6, %v1511_v23, %v1510_v36  ;;  %v745_v35 = vrot.slane %v5612_v52, 1  ;;  %v746_v29 = vrot.slane %v4744_v18, 1  ;;  %v5618_v23 = vld [vmem:[#allocation6_spill] sm:$0xff]  ;;  %v5620_v13 = vld [vmem:[#allocation63_spill] sm:$0xff] }
  0xbb   : > { %v4844_v56 = vsel %vm900_vm6, %v1231_v32, %v1230_v27  ;;  %1609 = vmatprep.mubr.f32.mxu0 %v1512_v37  ;;  %v803_v45 = vsub.f32 %v5613_v11, %v739_v55  ;;  %v804_v53 = vsub.f32 %v5614_v51, %v740_v1  ;;  %v805_v8 = vsub.f32 %v5615_v14, %v741_v0  ;;  %v2599_v1 = vld [vmem:[%s5293_s3 + $0x60] sm:$0xff]  ;;  %v2600_v0 = vld [vmem:[%s5293_s3 + $0x68] sm:$0xff] }
  0xbc   : > { %v1278_v30 = vrot.slane %v4844_v56, 2  ;;  %v806_v32 = vsub.f32 %v5616_v3, %v742_v62  ;;  %v807_v59 = vsub.f32 %v5617_v31, %v743_v34  ;;  %v808_v33 = vsub.f32 %v5618_v23, %v744_v61  ;;  %v5623_v14 = vld [vmem:[#allocation14_spill] sm:$0xff]  ;;  %v5624_v31 = vld [vmem:[#allocation20_spill] sm:$0xff] }
  0xbd   : > { %v5619_v28 = vrot.slane %v4696_v58, 2  ;;  %v809_v18 = vsub.f32 %v5620_v13, %v745_v35  ;;  %v810_v55 = vsub.f32 %v5621_v43, %v746_v29  ;;  %v1439_v27 = vrot.slane %v804_v53, 7  ;;  %v5622_v35 = vld [vmem:[#allocation30_spill] sm:$0xff] }
  0xbe   : > { %v1441_v36 = vrot.slane %v805_v8, 6  ;;  %v1443_v62 = vrot.slane %v806_v32, 5  ;;  %v1445_v34 = vrot.slane %v807_v59, 4  ;;  %v1447_v58 = vrot.slane %v808_v33, 3 }
  0xbf   : > { %v1279_v38 = vsel %vm1267_vm8, %v5619_v28, %v1278_v30  ;;  %v1440_v37 = vsel %vm903_vm5, %v1439_v27, %v803_v45  ;;  %v1449_v61 = vrot.slane %v809_v18, 2  ;;  %v1451_v52 = vrot.slane %v810_v55, 1 }
  0xc0   : > { %1369 = vmatmul.mubr.f32.gmra.mrb[4].mxu1 %v1279_v38  ;;  %v1262_v29 = vsel %vm903_vm5, %v4494_v40, %v5622_v35  ;;  %v1442_v11 = vsel %vm885_vm0, %v1441_v36, %v1440_v37  ;;  %v3276_v53 = vpack.c.bf16 %v2600_v0, %v2599_v1  ;;  %v561_v3 = vmul.f32 %v3889_v42, %v5623_v14 }
  0xc1   : > { %v1284_v51 = vrot.slane %v1262_v29, 2  ;;  %v1444_v8 = vsel %vm888_vm1, %v1443_v62, %v1442_v11  ;;  %v562_v32 = vmul.f32 %v3889_v42, %v4494_v40  ;;  %v625_v45 = vrot.slane %v5624_v31, 6 }
  0xc2   : > { %v1513_v59 = vrot.slane %v5593_v26, 2  ;;  %v1446_v23 = vsel %vm891_vm2, %v1445_v34, %v1444_v8  ;;  %v5625_v33 = vrot.slane %v4777_v2, 2  ;;  %3277 = vmatprep.subr.bf16.mxu1 %v3276_v53  ;;  %v1514_v38 = vrot.slane %v5595_v50, 1 }
  0xc3   : > { %v1517_v13 = vrot.slane %v5600_v12, 7  ;;  %v1448_v18 = vsel %vm894_vm3, %v1447_v58, %v1446_v23  ;;  %v689_v43 = vsub.f32 %v561_v3, %v625_v45  ;;  %v5626_v42 = vrot.slane %v4519_v57, 6  ;;  %3279 = vmatpush3.bf16.msra.mxu1 %v3276_v53  ;;  %v5627_v45 = vld [vmem:[#allocation64_spill] sm:$0xff] }
  0xc4   : > { %v1285_v28 = vsel %vm1267_vm8, %v5625_v33, %v1284_v51  ;;  %v1519_v27 = vrot.slane %v5602_v7, 6  ;;  %v1450_v1 = vsel %vm897_vm4, %v1449_v61, %v1448_v18  ;;  %v1515_v2 = vsel %vm903_vm5, %v1514_v38, %v1513_v59  ;;  %v5628_v33 = vld [vmem:[#allocation65_spill] sm:$0xff] }
  0xc5   : > { %1373 = vmatprep.mubr.f32.mxu1 %v1285_v28  ;;  %v690_v55 = vsub.f32 %v562_v32, %v5626_v42  ;;  %v1521_v0 = vrot.slane %v5605_v20, 5  ;;  %v1523_v12 = vrot.slane %v5623_v14, 4  ;;  %v1452_v36 = vsel %vm900_vm6, %v1451_v52, %v1450_v1 }
  0xc6   : > { %v1233_v62 = vrot.slane %v689_v43, 2  ;;  %v1516_v57 = vsel %vm885_vm0, %v5597_v15, %v1515_v2  ;;  %1610 = vmatmul.mubr.f32.gmra.mrb[12].mxu0 %v1452_v36  ;;  %v1525_v58 = vrot.slane %v4494_v40, 3  ;;  %v4904_v37 = vadd.f32 %v1514_v38, %v5595_v50  ;;  %v5632_v43 = vld [vmem:[#allocation69_spill] sm:$0xff] }
  0xc7   : > { %v1234_v34 = vrot.slane %v690_v55, 1  ;;  %v1518_v7 = vsel %vm888_vm1, %v1517_v13, %v1516_v57  ;;  %v747_v61 = vrot.slane %v4748_v21, 1  ;;  %v748_v52 = vrot.slane %v4756_v48, 1  ;;  %v3335_v13 = vld [vmem:[%s3626_s18] sm:$0x7]  ;;  %v5633_v55 = vld [vmem:[#allocation70_spill] sm:$0xff] }
  0xc8   : > { %v1520_v29 = vsel %vm891_vm2, %v1519_v27, %v1518_v7  ;;  %v749_v11 = vrot.slane %v4760_v19, 1  ;;  %v750_v53 = vrot.slane %v4768_v39, 1  ;;  %v751_v14 = vrot.slane %v4772_v63, 1  ;;  %v2601_v39 = vld [vmem:[%s5293_s3 + $0x70] sm:$0xff]  ;;  %v2602_v63 = vld [vmem:[%s5293_s3 + $0x78] sm:$0xff] }
  0xc9   : > { %v1235_v20 = vsel %vm903_vm5, %v1234_v34, %v1233_v62  ;;  %v1522_v15 = vsel %vm894_vm3, %v1521_v0, %v1520_v29  ;;  %v752_v21 = vrot.slane %v4781_v60, 1  ;;  %v753_v8 = vrot.slane %v561_v3, 1  ;;  %v5629_v60 = vld [vmem:[#allocation66_spill] sm:$0xff]  ;;  %v5630_v3 = vld [vmem:[#allocation67_spill] sm:$0xff] }
  0xca   : > { %v1282_v51 = vrot.slane %v1235_v20, 2  ;;  %v1524_v50 = vsel %vm897_vm4, %v1523_v12, %v1522_v15  ;;  %v754_v31 = vrot.slane %v562_v32, 1  ;;  %v811_v23 = vsub.f32 %v5627_v45, %v747_v61  ;;  %v5631_v32 = vld [vmem:[#allocation68_spill] sm:$0xff]  ;;  %v3336_v20 = vld [vmem:[%s3626_s18 + $0x8] sm:$0x7] }
  0xcb   : > { %v1526_v19 = vsel %vm900_vm6, %v1525_v58, %v1524_v50  ;;  %v812_v28 = vsub.f32 %v5628_v33, %v748_v52  ;;  %v813_v56 = vsub.f32 %v5629_v60, %v749_v11  ;;  %v815_v38 = vsub.f32 %v5631_v32, %v751_v14  ;;  %v3337_v52 = vld [vmem:[%s3626_s18 + $0xc] sm:$0x7]  ;;  %v3338_v11 = vld [vmem:[%s3626_s18 + $0x10] sm:$0x7]  ;;  %v3340_v50 = vld [vmem:[%s3626_s18 + $0x1c] sm:$0x7] }
  0xcc   : > { %v1283_v48 = vsel %vm1267_vm8, %v1278_v30, %v1282_v51  ;;  %1614 = vmatprep.mubr.f32.mxu0 %v1526_v19  ;;  %v814_v30 = vsub.f32 %v5630_v3, %v750_v53  ;;  %v2412_v18 = vrot.slane %v3335_v13, 1  ;;  %v816_v42 = vsub.f32 %v5632_v43, %v752_v21  ;;  %v3339_v53 = vld [vmem:[%s3626_s18 + $0x14] sm:$0x7]  ;;  %v3342_v3 = vld [vmem:[%s3626_s18 + $0x4] sm:$0x7] }
  0xcd   : > { %1374 = vmatmul.mubr.f32.gmra.mrb[6].mxu1 %v1283_v48  ;;  %v817_v27 = vsub.f32 %v5633_v55, %v753_v8  ;;  %v818_v1 = vsub.f32 %v4524_v9, %v754_v31  ;;  %v1453_v2 = vrot.slane %v812_v28, 7  ;;  %v1455_v0 = vrot.slane %v813_v56, 6  ;;  %v3341_v28 = vld [vmem:[%s3626_s18 + $0x18] sm:$0x7] }
  0xce   : > { %v1457_v12 = vrot.slane %v814_v30, 5  ;;  %v1459_v36 = vrot.slane %v815_v38, 4  ;;  %v3280_v62 = vpack.c.bf16 %v2602_v63, %v2601_v39  ;;  %v1461_v57 = vrot.slane %v816_v42, 3  ;;  %v5634_v39 = vld [vmem:[#allocation24_spill] sm:$0xff] }
  0xcf   : > { %v1454_v34 = vsel %vm903_vm5, %v1453_v2, %v811_v23  ;;  %v1463_v7 = vrot.slane %v817_v27, 2  ;;  %v1465_v58 = vrot.slane %v818_v1, 1  ;;  %v2413_v29 = vrot.slane %v3336_v20, 1 }
  0xd0   : > { %v1456_v61 = vsel %vm885_vm0, %v1455_v0, %v1454_v34  ;;  %3281 = vmatprep.subr.bf16.mxu1 %v3280_v62  ;;  %v2414_v9 = vrot.slane %v3337_v52, 1  ;;  %v2415_v51 = vrot.slane %v3338_v11, 1  ;;  %v2416_v14 = vrot.slane %v3339_v53, 1 }
  0xd1   : > { %v1458_v15 = vsel %vm888_vm1, %v1457_v12, %v1456_v61  ;;  %3283 = vmatpush3.bf16.msra.mxu1 %v3280_v62  ;;  %v2417_v21 = vrot.slane %v3340_v50, 1  ;;  %v2467_v8 = vadd.f32 %v3335_v13, %v2412_v18  ;;  %v2469_v48 = vadd.f32 %v3336_v20, %v2413_v29 }
  0xd2   : > { %v1460_v31 = vsel %vm891_vm2, %v1459_v36, %v1458_v15  ;;  %v2470_v19 = vadd.f32 %v3337_v52, %v2414_v9  ;;  %v2471_v45 = vadd.f32 %v3338_v11, %v2415_v51  ;;  %v2472_v33 = vadd.f32 %v3339_v53, %v2416_v14  ;;  %v5636_v36 = vld [vmem:[#allocation23_spill] sm:$0xff]  ;;  %v3343_v14 = vld [vmem:[%s3626_s18 + $0x3c] sm:$0x7] }
  0xd3   : > { %v1462_v23 = vsel %vm894_vm3, %v1461_v57, %v1460_v31  ;;  %v2473_v63 = vadd.f32 %v3341_v28, %v5634_v39  ;;  %v2474_v60 = vadd.f32 %v3340_v50, %v2417_v21  ;;  %v2499_v30 = vrot.slane %v3342_v3, 2 }
  0xd4   : > { %v1464_v56 = vsel %vm897_vm4, %v1463_v7, %v1462_v23  ;;  %v2500_v32 = vrot.slane %v3336_v20, 2  ;;  %v2501_v38 = vrot.slane %v3337_v52, 2  ;;  %v2502_v18 = vrot.slane %v3338_v11, 2 }
  0xd5   : > { %v1466_v13 = vsel %vm900_vm6, %v1465_v58, %v1464_v56  ;;  %v2503_v43 = vrot.slane %v3341_v28, 2  ;;  %v2504_v42 = vrot.slane %v3340_v50, 2  ;;  %v5635_v55 = vrot.slane %v3658_v46, 2 }
  0xd6   : > { %1615 = vmatmul.mubr.f32.gmra.mrb[14].mxu0 %v1466_v13  ;;  %v2556_v1 = vadd.f32 %v2499_v30, %v4546_v10  ;;  %v2557_v2 = vadd.f32 %v2500_v32, %v2469_v48  ;;  %v2558_v0 = vadd.f32 %v2501_v38, %v2470_v19  ;;  %v2559_v12 = vadd.f32 %v2502_v18, %v2471_v45  ;;  %v5637_v38 = vld [vmem:[#allocation26_spill] sm:$0xff]  ;;  %v5638_v18 = vld [vmem:[#allocation27_spill] sm:$0xff] }
  0xd7   : > { %v2555_v27 = vadd.f32 %v2467_v8, %v5635_v55  ;;  %v2560_v62 = vadd.f32 %v2472_v33, %v5636_v36  ;;  %v2561_v34 = vadd.f32 %v2503_v43, %v2473_v63  ;;  %v2562_v57 = vadd.f32 %v2504_v42, %v2474_v60 }
  0xd8   : > { %v2642_v7 = vrot.slane %v2556_v1, 7  ;;  %v2644_v61 = vrot.slane %v2557_v2, 6  ;;  %v2646_v58 = vrot.slane %v2558_v0, 5  ;;  %v2419_v20 = vrot.slane %v4678_v54, 1 }
  0xd9   : > { %v2648_v29 = vrot.slane %v2559_v12, 4  ;;  %v2650_v52 = vrot.slane %v2560_v62, 3  ;;  %v2652_v9 = vrot.slane %v2561_v34, 2  ;;  %v2654_v46 = vrot.slane %v2562_v57, 1  ;;  %v3344_v62 = vld [vmem:[%s3626_s18 + $0x48] sm:$0x7] }
  0xda   : > { %v2643_v11 = vsel %vm903_vm5, %v2642_v7, %v2555_v27  ;;  %v2420_v10 = vrot.slane %v4663_v17, 1  ;;  %v2421_v51 = vrot.slane %v4669_v24, 1  ;;  %v2422_v15 = vrot.slane %v4673_v6, 1  ;;  %v3345_v57 = vld [vmem:[%s3626_s18 + $0x4c] sm:$0x7] }
  0xdb   : > { %v2645_v53 = vsel %vm885_vm0, %v2644_v61, %v2643_v11  ;;  %v2423_v50 = vrot.slane %v3343_v14, 1  ;;  %v2477_v21 = vadd.f32 %v4678_v54, %v2419_v20  ;;  %v2506_v8 = vrot.slane %v4678_v54, 2  ;;  %v3346_v7 = vld [vmem:[%s3626_s18 + $0x50] sm:$0x7]  ;;  %v3347_v20 = vld [vmem:[%s3626_s18 + $0x54] sm:$0x7] }
  0xdc   : > { %v2647_v31 = vsel %vm888_vm1, %v2646_v58, %v2645_v53  ;;  %v2478_v48 = vadd.f32 %v4663_v17, %v2420_v10  ;;  %v2479_v19 = vadd.f32 %v4669_v24, %v2421_v51  ;;  %v2480_v45 = vadd.f32 %v4673_v6, %v2422_v15 }
  0xdd   : > { %v2649_v23 = vsel %vm891_vm2, %v2648_v29, %v2647_v31  ;;  %v2482_v33 = vadd.f32 %v3343_v14, %v2423_v50  ;;  %v2507_v28 = vrot.slane %v4663_v17, 2  ;;  %v2508_v39 = vrot.slane %v4669_v24, 2  ;;  %v5639_v50 = vld [vmem:[#allocation52_spill] sm:$0xff] }
  0xde   : > { %v2651_v63 = vsel %vm894_vm3, %v2650_v52, %v2649_v23  ;;  %v2509_v60 = vrot.slane %v4683_v4, 2  ;;  %v2510_v54 = vrot.slane %v3343_v14, 2  ;;  %v2565_v56 = vadd.f32 %v2506_v8, %v2477_v21  ;;  %v3348_v52 = vld [vmem:[%s3626_s18 + $0x5c] sm:$0x7]  ;;  %v3349_v14 = vld [vmem:[%s3626_s18 + $0x58] sm:$0x7] }
  0xdf   : > { %v2653_v3 = vsel %vm897_vm4, %v2652_v9, %v2651_v63  ;;  %v2566_v30 = vadd.f32 %v2507_v28, %v2478_v48  ;;  %v2567_v32 = vadd.f32 %v2508_v39, %v2479_v19  ;;  %v2568_v6 = vadd.f32 %v2480_v45, %v5637_v38 }
  0xe0   : > { %v2655_v13 = vsel %vm900_vm6, %v2654_v46, %v2653_v3  ;;  %v2569_v17 = vadd.f32 %v2509_v60, %v5638_v18  ;;  %v2570_v43 = vadd.f32 %v2510_v54, %v2482_v33  ;;  %v2656_v24 = vrot.slane %v4699_v22, 7  ;;  %v3350_v18 = vld [vmem:[%s3626_s18 + $0x60] sm:$0x7] }
  0xe1   : > { %3150 = vmatprep.mubr.f32.mxu1 %v2655_v13  ;;  %v2658_v4 = vrot.slane %v2565_v56, 6  ;;  %v2660_v42 = vrot.slane %v2566_v30, 5  ;;  %v2662_v55 = vrot.slane %v2567_v32, 4  ;;  %v2664_v27 = vrot.slane %v2568_v6, 3 }
  0xe2   : > { %v2657_v1 = vsel %vm903_vm5, %v2656_v24, %v4704_v49  ;;  %v2666_v2 = vrot.slane %v2569_v17, 2  ;;  %v2668_v0 = vrot.slane %v2570_v43, 1  ;;  %v2424_v12 = vrot.slane %v4806_v25, 1 }
  0xe3   : > { %v2659_v36 = vsel %vm885_vm0, %v2658_v4, %v2657_v1  ;;  %v2425_v34 = vrot.slane %v3344_v62, 1  ;;  %v2426_v22 = vrot.slane %v3345_v57, 1  ;;  %v2427_v61 = vrot.slane %v3346_v7, 1  ;;  %v3351_v4 = vld [vmem:[%s3626_s18 + $0x68] sm:$0x7] }
  0xe4   : > { %v2661_v58 = vsel %vm888_vm1, %v2660_v42, %v2659_v36  ;;  %v2428_v29 = vrot.slane %v3347_v20, 1  ;;  %v2429_v9 = vrot.slane %v3348_v52, 1  ;;  %v2483_v49 = vadd.f32 %v4806_v25, %v2424_v12 }
  0xe5   : > { %v2663_v46 = vsel %vm891_vm2, %v2662_v55, %v2661_v58  ;;  %v2485_v11 = vadd.f32 %v3344_v62, %v2425_v34  ;;  %v2486_v10 = vadd.f32 %v3345_v57, %v2426_v22  ;;  %v2487_v51 = vadd.f32 %v3346_v7, %v2427_v61  ;;  %v3352_v55 = vld [vmem:[%s3626_s18 + $0x6c] sm:$0x7] }
  0xe6   : > { %v2665_v15 = vsel %vm894_vm3, %v2664_v27, %v2663_v46  ;;  %v2488_v53 = vadd.f32 %v3347_v20, %v2428_v29  ;;  %v2489_v21 = vadd.f32 %v3349_v14, %v5639_v50  ;;  %v2490_v8 = vadd.f32 %v3348_v52, %v2429_v9  ;;  %v3353_v27 = vld [vmem:[%s3626_s18 + $0x70] sm:$0x7]  ;;  %v3356_v29 = vld [vmem:[%s3626_s18 + $0x64] sm:$0x7] }
  0xe7   : > { %v2667_v31 = vsel %vm897_vm4, %v2666_v2, %v2665_v15  ;;  %v2511_v48 = vrot.slane %v4810_v41, 2  ;;  %v2512_v19 = vrot.slane %v3344_v62, 2  ;;  %v2513_v45 = vrot.slane %v3345_v57, 2  ;;  %v3355_v62 = vld [vmem:[%s3626_s18 + $0x78] sm:$0x7] }
  0xe8   : > { %v2669_v23 = vsel %vm900_vm6, %v2668_v0, %v2667_v31  ;;  %v2514_v33 = vrot.slane %v3346_v7, 2  ;;  %v2515_v28 = vrot.slane %v3349_v14, 2  ;;  %v2516_v39 = vrot.slane %v3348_v52, 2  ;;  %v3354_v0 = vld [vmem:[%s3626_s18 + $0x74] sm:$0x7]  ;;  %s5247_s18 = scalar_lea.hbm %s5297_s7, %s2965_s16 }
  0xe9   : > { %3151 = vmatmul.mubr.f32.vlgmr.msra.gmra.mrb[8].mxu1 %v2669_v23  ;;  %v2571_v63 = vadd.f32 %v2483_v49, %v1499_v5  ;;  %v2572_v60 = vadd.f32 %v2511_v48, %v4832_v16  ;;  %v2573_v54 = vadd.f32 %v2512_v19, %v2485_v11  ;;  %v2574_v56 = vadd.f32 %v2513_v45, %v2486_v10  ;;  %v5640_v19 = vld [vmem:[#allocation71_spill] sm:$0xff] }
  0xea   : > { %v2575_v3 = vadd.f32 %v2514_v33, %v2487_v51  ;;  %v2576_v41 = vadd.f32 %v2488_v53, %v5572_v44  ;;  %v2577_v30 = vadd.f32 %v2515_v28, %v2489_v21  ;;  %v2578_v32 = vadd.f32 %v2516_v39, %v2490_v8 }
  0xeb   : > { %v2670_v38 = vrot.slane %v2572_v60, 7  ;;  %v2672_v6 = vrot.slane %v2573_v54, 6  ;;  %v2674_v13 = vrot.slane %v2574_v56, 5  ;;  %v2430_v17 = vrot.slane %v3350_v18, 1 }
  0xec   : > { %v2676_v25 = vrot.slane %v2575_v3, 4  ;;  %v2678_v5 = vrot.slane %v2576_v41, 3  ;;  %v2680_v16 = vrot.slane %v2577_v30, 2  ;;  %v2682_v43 = vrot.slane %v2578_v32, 1  ;;  %v5030_v32 = vld [vmem:[%s5294_s4] sm:$0x7] }
  0xed   : > { %v2671_v24 = vsel %vm903_vm5, %v2670_v38, %v2571_v63  ;;  %v2431_v42 = vrot.slane %v3351_v4, 1  ;;  %v2432_v44 = vrot.slane %v3352_v55, 1  ;;  %v2433_v1 = vrot.slane %v3353_v27, 1 }
  0xee   : > { %v2673_v2 = vsel %vm885_vm0, %v2672_v6, %v2671_v24  ;;  %v2434_v12 = vrot.slane %v3354_v0, 1  ;;  %v2491_v36 = vadd.f32 %v3350_v18, %v2430_v17  ;;  %v2497_v34 = vadd.f32 %v3355_v62, %v5622_v35 }
  0xef   : > { %v2675_v57 = vsel %vm888_vm1, %v2674_v13, %v2673_v2  ;;  %v2493_v22 = vadd.f32 %v3351_v4, %v2431_v42  ;;  %v2494_v7 = vadd.f32 %v3352_v55, %v2432_v44  ;;  %v2495_v61 = vadd.f32 %v3353_v27, %v2433_v1  ;;  %v5641_v13 = vld [vmem:[#allocation9_spill] sm:$0xff] }
  0xf0   : > { %v2677_v58 = vsel %vm891_vm2, %v2676_v25, %v2675_v57  ;;  %v2496_v20 = vadd.f32 %v3354_v0, %v2434_v12  ;;  %v2517_v52 = vrot.slane %v3356_v29, 2  ;;  %v2518_v9 = vrot.slane %v3351_v4, 2 }
  0xf1   : > { %v2679_v49 = vsel %vm894_vm3, %v2678_v5, %v2677_v58  ;;  %v2519_v46 = vrot.slane %v3352_v55, 2  ;;  %v2520_v11 = vrot.slane %v3353_v27, 2  ;;  %v2521_v10 = vrot.slane %v3355_v62, 2 }
  0xf2   : > { %v2681_v51 = vsel %vm897_vm4, %v2680_v16, %v2679_v49  ;;  %v2522_v35 = vrot.slane %v4494_v40, 2  ;;  %v2579_v15 = vadd.f32 %v2491_v36, %v1513_v59  ;;  %v2580_v53 = vadd.f32 %v2517_v52, %v4904_v37 }
  0xf3   : > { %v2683_v14 = vsel %vm900_vm6, %v2682_v43, %v2681_v51  ;;  %v2581_v50 = vadd.f32 %v2518_v9, %v2493_v22  ;;  %v2582_v21 = vadd.f32 %v2519_v46, %v2494_v7  ;;  %v2583_v8 = vadd.f32 %v2520_v11, %v2495_v61 }
  0xf4   : > { %3153 = vmatprep.mubr.f32.mxu1 %v2683_v14  ;;  %v2584_v31 = vadd.f32 %v2496_v20, %v5604_v47  ;;  %v2585_v48 = vadd.f32 %v2521_v10, %v2497_v34  ;;  %v2586_v45 = vadd.f32 %v2522_v35, %v5640_v19  ;;  %v2684_v23 = vrot.slane %v2580_v53, 7 }
  0xf5   : > { %v2686_v33 = vrot.slane %v2581_v50, 6  ;;  %v2688_v28 = vrot.slane %v2582_v21, 5  ;;  %v2690_v40 = vrot.slane %v2583_v8, 4  ;;  %v3421_v41 = vmov 1966171168  }
  0xf6   : > { %v2685_v26 = vsel %vm903_vm5, %v2684_v23, %v2579_v15  ;;  %v2692_v59 = vrot.slane %v2584_v31, 3  ;;  %v2694_v39 = vrot.slane %v2585_v48, 2  ;;  %v2696_v60 = vrot.slane %v2586_v45, 1 }
  0xf7   : > { %v2687_v37 = vsel %vm885_vm0, %v2686_v33, %v2685_v26  ;;  %v1626_v30 = vunpack.c.l.s4 %v3421_v41  ;;  %v5642_v18 = vsub.s32 0, %v5641_v13  ;;  %v5643_v50 = vsub.s32 1, %v5641_v13 }
  0xf8   : > { %v2689_v63 = vsel %vm888_vm1, %v2688_v28, %v2687_v37 }
  0xf9   : > { %v2691_v54 = vsel %vm891_vm2, %v2690_v40, %v2689_v63  ;;  %v1627_v38 = vunpack.c.0.s8 %v1626_v30  ;;  %v5035_v17 = vrot.slane %v5030_v32, %v5642_v18  ;;  %v5080_v21 = vrot.slane %v5030_v32, %v5643_v50 }
  0xfa   : > { %v2693_v47 = vsel %vm894_vm3, %v2692_v59, %v2691_v54 }
  0xfb   : > { %v2695_v56 = vsel %vm897_vm4, %v2694_v39, %v2693_v47  ;;  %v5038_v5 = vsub.s32 %v1627_v38, %v5641_v13 }
  0xfc   : > { %v2697_v3 = vsel %vm900_vm6, %v2696_v60, %v2695_v56 }
  0xfd   : > { %3154 = vmatmul.mubr.f32.gmra.mrb[10].mxu1 %v2697_v3 }
 0x123   : > { %v2998_v6 = vpop.f32.mrb[0].mxu0 }
 0x124   : > { %v2999_v25 = vpop.f32.mrb[1].mxu0 }
 0x125   : > { %v3000_v16 = vadd.f32 %v2999_v25, %v2998_v6 }
 0x127   : > { %v1131_v43 = vadd.f32 %v3000_v16, %v5035_v17 }
 0x129   : > { %v1624_v24 = vcombine.high %v1131_v43, %v1131_v43  ;;  %v1631_v4 = vrot.slane %v1131_v43, %v5038_v5 }
 0x12b   : > { %v1638_v42 = vrot.slane %v1624_v24, %v5038_v5  ;;  %v1639_v55 = vcombine.high %v1631_v4, %v1631_v4  ;;  %v1647_v44 = vrot.slane %v1631_v4, %v5038_v5  ;;  %2911 = vst.sshfl [vmem:[%s5046_s8] sm:$0x1 pattern:$0x73625140] %v1631_v4 }
 0x12d   : > { %v1640_v27 = vcombine.high %v1638_v42, %v1638_v42  ;;  %v1654_v1 = vrot.slane %v1638_v42, %v5038_v5  ;;  %v1661_v2 = vrot.slane %v1639_v55, %v5038_v5  ;;  %v1669_v0 = vcombine.high %v1647_v44, %v1647_v44  ;;  %2912 = vst.sshfl [vmem:[%s5046_s8 + $0x4] sm:$0x1 pattern:$0x73625140] %v1639_v55 }
 0x12e   : > { %2913 = vst.sshfl [vmem:[%s5046_s8 + $0x10] sm:$0x1 pattern:$0x73625140] %v1638_v42  ;;  %v5644_v42 = vsub.s32 2, %v5641_v13 }
 0x12f   : > { %v1668_v12 = vrot.slane %v1640_v27, %v5038_v5  ;;  %v1670_v36 = vcombine.high %v1654_v1, %v1654_v1  ;;  %v1671_v62 = vcombine.high %v1661_v2, %v1661_v2  ;;  %1854 = vst [vmem:[%s5046_s8 + $0x8] sm:$0x1] %v1669_v0  ;;  %2914 = vst.sshfl [vmem:[%s5046_s8 + $0x14] sm:$0x1 pattern:$0x73625140] %v1640_v27 }
 0x130   : > { %v5106_v55 = vrot.slane %v5030_v32, %v5644_v42 }
 0x131   : > { %v1672_v34 = vcombine.high %v1668_v12, %v1668_v12  ;;  %1855 = vst [vmem:[%s5046_s8 + $0xc] sm:$0x1] %v1671_v62  ;;  %1858 = vst [vmem:[%s5046_s8 + $0x18] sm:$0x1] %v1670_v36 }
 0x133   : > { %1859 = vst [vmem:[%s5046_s8 + $0x1c] sm:$0x1] %v1672_v34 }
 0x13c   : > { %v3001_v57 = vpop.f32.mrb[2].mxu0 }
 0x13d   : > { %v3002_v22 = vpop.f32.mrb[3].mxu0 }
 0x13e   : > { %v3003_v7 = vadd.f32 %v3002_v22, %v3001_v57 }
 0x140   : > { %v1136_v61 = vadd.f32 %v3003_v7, %v5035_v17 }
 0x142   : > { %v1673_v58 = vcombine.high %v1136_v61, %v1136_v61  ;;  %v1680_v20 = vrot.slane %v1136_v61, %v5038_v5 }
 0x144   : > { %v1687_v29 = vrot.slane %v1673_v58, %v5038_v5  ;;  %v1688_v52 = vcombine.high %v1680_v20, %v1680_v20  ;;  %v1696_v9 = vrot.slane %v1680_v20, %v5038_v5  ;;  %2915 = vst.sshfl [vmem:[%s5046_s8 + $0x20] sm:$0x1 pattern:$0x73625140] %v1680_v20 }
 0x146   : > { %v1689_v49 = vcombine.high %v1687_v29, %v1687_v29  ;;  %v1703_v46 = vrot.slane %v1687_v29, %v5038_v5  ;;  %v1710_v11 = vrot.slane %v1688_v52, %v5038_v5  ;;  %v1718_v10 = vcombine.high %v1696_v9, %v1696_v9  ;;  %2916 = vst.sshfl [vmem:[%s5046_s8 + $0x24] sm:$0x1 pattern:$0x73625140] %v1688_v52 }
 0x147   : > { %2917 = vst.sshfl [vmem:[%s5046_s8 + $0x30] sm:$0x1 pattern:$0x73625140] %v1687_v29 }
 0x148   : > { %v1717_v51 = vrot.slane %v1689_v49, %v5038_v5  ;;  %v1719_v35 = vcombine.high %v1703_v46, %v1703_v46  ;;  %v1720_v15 = vcombine.high %v1710_v11, %v1710_v11  ;;  %1862 = vst [vmem:[%s5046_s8 + $0x28] sm:$0x1] %v1718_v10  ;;  %2918 = vst.sshfl [vmem:[%s5046_s8 + $0x34] sm:$0x1 pattern:$0x73625140] %v1689_v49 }
 0x14a   : > { %v1721_v53 = vcombine.high %v1717_v51, %v1717_v51  ;;  %1863 = vst [vmem:[%s5046_s8 + $0x2c] sm:$0x1] %v1720_v15  ;;  %1866 = vst [vmem:[%s5046_s8 + $0x38] sm:$0x1] %v1719_v35 }
 0x14c   : > { %1867 = vst [vmem:[%s5046_s8 + $0x3c] sm:$0x1] %v1721_v53  ;;  %v3042_v14 = vpop.f32.mrb[0].mxu1 }
 0x14d   : > { %v3043_v8 = vpop.f32.mrb[1].mxu1 }
 0x14e   : > { %v3044_v31 = vadd.f32 %v3043_v8, %v3042_v14 }
 0x150   : > { %v1361_v48 = vadd.f32 %v3044_v31, %v5080_v21 }
 0x152   : > { %v1888_v19 = vcombine.high %v1361_v48, %v1361_v48  ;;  %v1895_v45 = vrot.slane %v1361_v48, %v5038_v5 }
 0x154   : > { %v1902_v23 = vrot.slane %v1888_v19, %v5038_v5  ;;  %v1903_v33 = vcombine.high %v1895_v45, %v1895_v45  ;;  %v1911_v28 = vrot.slane %v1895_v45, %v5038_v5  ;;  %2927 = vst.sshfl [vmem:[%s5046_s8 + $0x1] sm:$0x1 pattern:$0x73625140] %v1895_v45 }
 0x156   : > { %v1904_v40 = vcombine.high %v1902_v23, %v1902_v23  ;;  %v1918_v26 = vrot.slane %v1902_v23, %v5038_v5  ;;  %v1925_v59 = vrot.slane %v1903_v33, %v5038_v5  ;;  %v1933_v37 = vcombine.high %v1911_v28, %v1911_v28  ;;  %2928 = vst.sshfl [vmem:[%s5046_s8 + $0x5] sm:$0x1 pattern:$0x73625140] %v1903_v33 }
 0x157   : > { %2929 = vst.sshfl [vmem:[%s5046_s8 + $0x11] sm:$0x1 pattern:$0x73625140] %v1902_v23 }
 0x158   : > { %v1932_v39 = vrot.slane %v1904_v40, %v5038_v5  ;;  %v1934_v63 = vcombine.high %v1918_v26, %v1918_v26  ;;  %v1935_v60 = vcombine.high %v1925_v59, %v1925_v59  ;;  %2118 = vst [vmem:[%s5046_s8 + $0x9] sm:$0x1] %v1933_v37  ;;  %2930 = vst.sshfl [vmem:[%s5046_s8 + $0x15] sm:$0x1 pattern:$0x73625140] %v1904_v40 }
 0x15a   : > { %v1936_v54 = vcombine.high %v1932_v39, %v1932_v39  ;;  %2119 = vst [vmem:[%s5046_s8 + $0xd] sm:$0x1] %v1935_v60  ;;  %2122 = vst [vmem:[%s5046_s8 + $0x19] sm:$0x1] %v1934_v63 }
 0x15c   : > { %2123 = vst [vmem:[%s5046_s8 + $0x1d] sm:$0x1] %v1936_v54 }
 0x15e   : > { %v3004_v47 = vpop.f32.mrb[4].mxu0 }
 0x15f   : > { %v3005_v56 = vpop.f32.mrb[5].mxu0 }
 0x160   : > { %v3006_v3 = vadd.f32 %v3005_v56, %v3004_v47 }
 0x162   : > { %v1141_v41 = vadd.f32 %v3006_v3, %v5035_v17  ;;  %v3007_v30 = vpop.f32.mrb[6].mxu0 }
 0x163   : > { %v3008_v38 = vpop.f32.mrb[7].mxu0 }
 0x164   : > { %v1722_v6 = vcombine.high %v1141_v41, %v1141_v41  ;;  %v1729_v18 = vrot.slane %v1141_v41, %v5038_v5  ;;  %v3009_v25 = vadd.f32 %v3008_v38, %v3007_v30 }
 0x166   : > { %v1736_v16 = vrot.slane %v1722_v6, %v5038_v5  ;;  %v1737_v43 = vcombine.high %v1729_v18, %v1729_v18  ;;  %v1745_v24 = vrot.slane %v1729_v18, %v5038_v5  ;;  %2919 = vst.sshfl [vmem:[%s5046_s8 + $0x40] sm:$0x1 pattern:$0x73625140] %v1729_v18  ;;  %v1146_v4 = vadd.f32 %v3009_v25, %v5035_v17 }
 0x168   : > { %v1738_v44 = vcombine.high %v1736_v16, %v1736_v16  ;;  %v1752_v27 = vrot.slane %v1736_v16, %v5038_v5  ;;  %v1759_v1 = vrot.slane %v1737_v43, %v5038_v5  ;;  %v1767_v2 = vcombine.high %v1745_v24, %v1745_v24  ;;  %2920 = vst.sshfl [vmem:[%s5046_s8 + $0x44] sm:$0x1 pattern:$0x73625140] %v1737_v43  ;;  %v3086_v0 = vpop.f32.mrb[8].mxu0 }
 0x169   : > { %2921 = vst.sshfl [vmem:[%s5046_s8 + $0x50] sm:$0x1 pattern:$0x73625140] %v1736_v16  ;;  %v1771_v12 = vcombine.high %v1146_v4, %v1146_v4  ;;  %v1778_v17 = vrot.slane %v1146_v4, %v5038_v5  ;;  %v3087_v13 = vpop.f32.mrb[9].mxu0 }
 0x16a   : > { %v1766_v36 = vrot.slane %v1738_v44, %v5038_v5  ;;  %v1768_v32 = vcombine.high %v1752_v27, %v1752_v27  ;;  %v1769_v62 = vcombine.high %v1759_v1, %v1759_v1  ;;  %1870 = vst [vmem:[%s5046_s8 + $0x48] sm:$0x1] %v1767_v2  ;;  %2922 = vst.sshfl [vmem:[%s5046_s8 + $0x54] sm:$0x1 pattern:$0x73625140] %v1738_v44 }
 0x16b   : > { %v3088_v34 = vadd.f32 %v3087_v13, %v3086_v0  ;;  %v1785_v57 = vrot.slane %v1771_v12, %v5038_v5  ;;  %v1786_v22 = vcombine.high %v1778_v17, %v1778_v17  ;;  %v1794_v7 = vrot.slane %v1778_v17, %v5038_v5  ;;  %2923 = vst.sshfl [vmem:[%s5046_s8 + $0x60] sm:$0x1 pattern:$0x73625140] %v1778_v17 }
 0x16c   : > { %v1770_v61 = vcombine.high %v1766_v36, %v1766_v36  ;;  %1871 = vst [vmem:[%s5046_s8 + $0x4c] sm:$0x1] %v1769_v62  ;;  %1874 = vst [vmem:[%s5046_s8 + $0x58] sm:$0x1] %v1768_v32 }
 0x16d   : > { %v1602_v58 = vadd.f32 %v3088_v34, %v5106_v55  ;;  %v1787_v20 = vcombine.high %v1785_v57, %v1785_v57  ;;  %v1801_v29 = vrot.slane %v1785_v57, %v5038_v5  ;;  %v1808_v52 = vrot.slane %v1786_v22, %v5038_v5  ;;  %2924 = vst.sshfl [vmem:[%s5046_s8 + $0x64] sm:$0x1 pattern:$0x73625140] %v1786_v22 }
 0x16e   : > { %v1816_v9 = vcombine.high %v1794_v7, %v1794_v7  ;;  %2925 = vst.sshfl [vmem:[%s5046_s8 + $0x70] sm:$0x1 pattern:$0x73625140] %v1785_v57  ;;  %1875 = vst [vmem:[%s5046_s8 + $0x5c] sm:$0x1] %v1770_v61 }
 0x16f   : > { %v2152_v49 = vcombine.high %v1602_v58, %v1602_v58  ;;  %v2159_v46 = vrot.slane %v1602_v58, %v5038_v5  ;;  %v1815_v11 = vrot.slane %v1787_v20, %v5038_v5  ;;  %v1817_v10 = vcombine.high %v1801_v29, %v1801_v29  ;;  %2926 = vst.sshfl [vmem:[%s5046_s8 + $0x74] sm:$0x1 pattern:$0x73625140] %v1787_v20 }
 0x170   : > { %v1818_v51 = vcombine.high %v1808_v52, %v1808_v52  ;;  %1878 = vst [vmem:[%s5046_s8 + $0x68] sm:$0x1] %v1816_v9 }
 0x171   : > { %v2166_v35 = vrot.slane %v2152_v49, %v5038_v5  ;;  %v2167_v15 = vcombine.high %v2159_v46, %v2159_v46  ;;  %v2175_v53 = vrot.slane %v2159_v46, %v5038_v5  ;;  %2943 = vst.sshfl [vmem:[%s5046_s8 + $0x2] sm:$0x1 pattern:$0x73625140] %v2159_v46  ;;  %v1819_v14 = vcombine.high %v1815_v11, %v1815_v11 }
 0x172   : > { %1879 = vst [vmem:[%s5046_s8 + $0x6c] sm:$0x1] %v1818_v51  ;;  %1882 = vst [vmem:[%s5046_s8 + $0x78] sm:$0x1] %v1817_v10 }
 0x173   : > { %v2168_v50 = vcombine.high %v2166_v35, %v2166_v35  ;;  %v2182_v8 = vrot.slane %v2166_v35, %v5038_v5  ;;  %v2189_v31 = vrot.slane %v2167_v15, %v5038_v5  ;;  %v2197_v48 = vcombine.high %v2175_v53, %v2175_v53  ;;  %2944 = vst.sshfl [vmem:[%s5046_s8 + $0x6] sm:$0x1 pattern:$0x73625140] %v2167_v15 }
 0x174   : > { %2945 = vst.sshfl [vmem:[%s5046_s8 + $0x12] sm:$0x1 pattern:$0x73625140] %v2166_v35  ;;  %1883 = vst [vmem:[%s5046_s8 + $0x7c] sm:$0x1] %v1819_v14 }
 0x175   : > { %v2196_v19 = vrot.slane %v2168_v50, %v5038_v5  ;;  %v2198_v45 = vcombine.high %v2182_v8, %v2182_v8  ;;  %v2199_v23 = vcombine.high %v2189_v31, %v2189_v31  ;;  %2382 = vst [vmem:[%s5046_s8 + $0xa] sm:$0x1] %v2197_v48  ;;  %2946 = vst.sshfl [vmem:[%s5046_s8 + $0x16] sm:$0x1 pattern:$0x73625140] %v2168_v50 }
 0x177   : > { %v2200_v33 = vcombine.high %v2196_v19, %v2196_v19  ;;  %2383 = vst [vmem:[%s5046_s8 + $0xe] sm:$0x1] %v2199_v23  ;;  %2386 = vst [vmem:[%s5046_s8 + $0x1a] sm:$0x1] %v2198_v45 }
 0x179   : > { %v3045_v28 = vpop.f32.mrb[2].mxu1  ;;  %2387 = vst [vmem:[%s5046_s8 + $0x1e] sm:$0x1] %v2200_v33 }
 0x17a   : > { %v3046_v40 = vpop.f32.mrb[3].mxu1 }
 0x17b   : > { %v3047_v26 = vadd.f32 %v3046_v40, %v3045_v28 }
 0x17d   : > { %v1366_v59 = vadd.f32 %v3047_v26, %v5080_v21 }
 0x17f   : > { %v1937_v37 = vcombine.high %v1366_v59, %v1366_v59  ;;  %v1944_v39 = vrot.slane %v1366_v59, %v5038_v5 }
 0x181   : > { %v1951_v63 = vrot.slane %v1937_v37, %v5038_v5  ;;  %v1952_v60 = vcombine.high %v1944_v39, %v1944_v39  ;;  %v1960_v54 = vrot.slane %v1944_v39, %v5038_v5  ;;  %2931 = vst.sshfl [vmem:[%s5046_s8 + $0x21] sm:$0x1 pattern:$0x73625140] %v1944_v39 }
 0x182   : > { %v3089_v30 = vpop.f32.mrb[10].mxu0 }
 0x183   : > { %v1953_v47 = vcombine.high %v1951_v63, %v1951_v63  ;;  %v1967_v56 = vrot.slane %v1951_v63, %v5038_v5  ;;  %v1974_v3 = vrot.slane %v1952_v60, %v5038_v5  ;;  %v1982_v41 = vcombine.high %v1960_v54, %v1960_v54  ;;  %2932 = vst.sshfl [vmem:[%s5046_s8 + $0x25] sm:$0x1 pattern:$0x73625140] %v1952_v60  ;;  %v3090_v38 = vpop.f32.mrb[11].mxu0 }
 0x184   : > { %2933 = vst.sshfl [vmem:[%s5046_s8 + $0x31] sm:$0x1 pattern:$0x73625140] %v1951_v63  ;;  %v3091_v16 = vadd.f32 %v3090_v38, %v3089_v30 }
 0x185   : > { %v1981_v6 = vrot.slane %v1953_v47, %v5038_v5  ;;  %v1983_v18 = vcombine.high %v1967_v56, %v1967_v56  ;;  %v1984_v25 = vcombine.high %v1974_v3, %v1974_v3  ;;  %2126 = vst [vmem:[%s5046_s8 + $0x29] sm:$0x1] %v1982_v41  ;;  %2934 = vst.sshfl [vmem:[%s5046_s8 + $0x35] sm:$0x1 pattern:$0x73625140] %v1953_v47 }
 0x186   : > { %v1607_v24 = vadd.f32 %v3091_v16, %v5106_v55 }
 0x187   : > { %v1985_v43 = vcombine.high %v1981_v6, %v1981_v6  ;;  %2127 = vst [vmem:[%s5046_s8 + $0x2d] sm:$0x1] %v1984_v25  ;;  %2130 = vst [vmem:[%s5046_s8 + $0x39] sm:$0x1] %v1983_v18 }
 0x188   : > { %v2201_v4 = vcombine.high %v1607_v24, %v1607_v24  ;;  %v2208_v42 = vrot.slane %v1607_v24, %v5038_v5 }
 0x189   : > { %2131 = vst [vmem:[%s5046_s8 + $0x3d] sm:$0x1] %v1985_v43 }
 0x18a   : > { %v2215_v44 = vrot.slane %v2201_v4, %v5038_v5  ;;  %v2216_v27 = vcombine.high %v2208_v42, %v2208_v42  ;;  %v2224_v1 = vrot.slane %v2208_v42, %v5038_v5  ;;  %2947 = vst.sshfl [vmem:[%s5046_s8 + $0x22] sm:$0x1 pattern:$0x73625140] %v2208_v42 }
 0x18c   : > { %v2217_v2 = vcombine.high %v2215_v44, %v2215_v44  ;;  %v2231_v0 = vrot.slane %v2215_v44, %v5038_v5  ;;  %v2238_v12 = vrot.slane %v2216_v27, %v5038_v5  ;;  %v2246_v17 = vcombine.high %v2224_v1, %v2224_v1  ;;  %2948 = vst.sshfl [vmem:[%s5046_s8 + $0x26] sm:$0x1 pattern:$0x73625140] %v2216_v27 }
 0x18d   : > { %2949 = vst.sshfl [vmem:[%s5046_s8 + $0x32] sm:$0x1 pattern:$0x73625140] %v2215_v44 }
 0x18e   : > { %v2245_v13 = vrot.slane %v2217_v2, %v5038_v5  ;;  %v2247_v36 = vcombine.high %v2231_v0, %v2231_v0  ;;  %v2248_v32 = vcombine.high %v2238_v12, %v2238_v12  ;;  %2390 = vst [vmem:[%s5046_s8 + $0x2a] sm:$0x1] %v2246_v17  ;;  %2950 = vst.sshfl [vmem:[%s5046_s8 + $0x36] sm:$0x1 pattern:$0x73625140] %v2217_v2 }
 0x190   : > { %v2249_v62 = vcombine.high %v2245_v13, %v2245_v13  ;;  %2391 = vst [vmem:[%s5046_s8 + $0x2e] sm:$0x1] %v2248_v32  ;;  %2394 = vst [vmem:[%s5046_s8 + $0x3a] sm:$0x1] %v2247_v36 }
 0x192   : > { %2395 = vst [vmem:[%s5046_s8 + $0x3e] sm:$0x1] %v2249_v62 }
 0x193   : > { %v3048_v34 = vpop.f32.mrb[4].mxu1 }
 0x194   : > { %v3049_v57 = vpop.f32.mrb[5].mxu1 }
 0x195   : > { %v3050_v22 = vadd.f32 %v3049_v57, %v3048_v34 }
 0x197   : > { %v1371_v7 = vadd.f32 %v3050_v22, %v5080_v21 }
 0x199   : > { %v1986_v61 = vcombine.high %v1371_v7, %v1371_v7  ;;  %v1993_v58 = vrot.slane %v1371_v7, %v5038_v5  ;;  %v3092_v9 = vpop.f32.mrb[12].mxu0 }
 0x19a   : > { %v3093_v49 = vpop.f32.mrb[13].mxu0 }
 0x19b   : > { %v2000_v20 = vrot.slane %v1986_v61, %v5038_v5  ;;  %v2001_v29 = vcombine.high %v1993_v58, %v1993_v58  ;;  %v2009_v52 = vrot.slane %v1993_v58, %v5038_v5  ;;  %2935 = vst.sshfl [vmem:[%s5046_s8 + $0x41] sm:$0x1 pattern:$0x73625140] %v1993_v58  ;;  %v3094_v35 = vadd.f32 %v3093_v49, %v3092_v9  ;;  %v2959_v58 = vld [vmem:[%s5295_s5] ss:$0 sm:$0xff] }
 0x19d   : > { %v2002_v46 = vcombine.high %v2000_v20, %v2000_v20  ;;  %v2016_v11 = vrot.slane %v2000_v20, %v5038_v5  ;;  %v2023_v10 = vrot.slane %v2001_v29, %v5038_v5  ;;  %v2031_v51 = vcombine.high %v2009_v52, %v2009_v52  ;;  %2936 = vst.sshfl [vmem:[%s5046_s8 + $0x45] sm:$0x1 pattern:$0x73625140] %v2001_v29 }
 0x19e   : > { %2937 = vst.sshfl [vmem:[%s5046_s8 + $0x51] sm:$0x1 pattern:$0x73625140] %v2000_v20  ;;  %v1612_v50 = vadd.f32 %v3094_v35, %v5106_v55 }
 0x19f   : > { %v2030_v15 = vrot.slane %v2002_v46, %v5038_v5  ;;  %v2032_v53 = vcombine.high %v2016_v11, %v2016_v11  ;;  %v2033_v14 = vcombine.high %v2023_v10, %v2023_v10  ;;  %2134 = vst [vmem:[%s5046_s8 + $0x49] sm:$0x1] %v2031_v51  ;;  %2938 = vst.sshfl [vmem:[%s5046_s8 + $0x55] sm:$0x1 pattern:$0x73625140] %v2002_v46 }
 0x1a0   : > { %v3051_v8 = vpop.f32.mrb[6].mxu1  ;;  %v2250_v19 = vcombine.high %v1612_v50, %v1612_v50  ;;  %v2257_v45 = vrot.slane %v1612_v50, %v5038_v5 }
 0x1a1   : > { %v2034_v31 = vcombine.high %v2030_v15, %v2030_v15  ;;  %2135 = vst [vmem:[%s5046_s8 + $0x4d] sm:$0x1] %v2033_v14  ;;  %2138 = vst [vmem:[%s5046_s8 + $0x59] sm:$0x1] %v2032_v53  ;;  %v3052_v48 = vpop.f32.mrb[7].mxu1 }
 0x1a2   : > { %v3053_v23 = vadd.f32 %v3052_v48, %v3051_v8  ;;  %v2264_v33 = vrot.slane %v2250_v19, %v5038_v5  ;;  %v2265_v28 = vcombine.high %v2257_v45, %v2257_v45  ;;  %v2273_v40 = vrot.slane %v2257_v45, %v5038_v5  ;;  %2951 = vst.sshfl [vmem:[%s5046_s8 + $0x42] sm:$0x1 pattern:$0x73625140] %v2257_v45 }
 0x1a3   : > { %2139 = vst [vmem:[%s5046_s8 + $0x5d] sm:$0x1] %v2034_v31 }
 0x1a4   : > { %v1376_v26 = vadd.f32 %v3053_v23, %v5080_v21  ;;  %v2266_v59 = vcombine.high %v2264_v33, %v2264_v33  ;;  %v2280_v37 = vrot.slane %v2264_v33, %v5038_v5  ;;  %v2287_v39 = vrot.slane %v2265_v28, %v5038_v5  ;;  %2952 = vst.sshfl [vmem:[%s5046_s8 + $0x46] sm:$0x1 pattern:$0x73625140] %v2265_v28 }
 0x1a5   : > { %v2295_v63 = vcombine.high %v2273_v40, %v2273_v40  ;;  %2953 = vst.sshfl [vmem:[%s5046_s8 + $0x52] sm:$0x1 pattern:$0x73625140] %v2264_v33 }
 0x1a6   : > { %v2035_v60 = vcombine.high %v1376_v26, %v1376_v26  ;;  %v2042_v54 = vrot.slane %v1376_v26, %v5038_v5  ;;  %v2294_v47 = vrot.slane %v2266_v59, %v5038_v5  ;;  %v2296_v56 = vcombine.high %v2280_v37, %v2280_v37  ;;  %2954 = vst.sshfl [vmem:[%s5046_s8 + $0x56] sm:$0x1 pattern:$0x73625140] %v2266_v59 }
 0x1a7   : > { %v2297_v3 = vcombine.high %v2287_v39, %v2287_v39  ;;  %2398 = vst [vmem:[%s5046_s8 + $0x4a] sm:$0x1] %v2295_v63 }
 0x1a8   : > { %v2049_v21 = vrot.slane %v2035_v60, %v5038_v5  ;;  %v2050_v41 = vcombine.high %v2042_v54, %v2042_v54  ;;  %v2058_v30 = vrot.slane %v2042_v54, %v5038_v5  ;;  %2939 = vst.sshfl [vmem:[%s5046_s8 + $0x61] sm:$0x1 pattern:$0x73625140] %v2042_v54  ;;  %v2298_v38 = vcombine.high %v2294_v47, %v2294_v47 }
 0x1a9   : > { %2399 = vst [vmem:[%s5046_s8 + $0x4e] sm:$0x1] %v2297_v3  ;;  %2402 = vst [vmem:[%s5046_s8 + $0x5a] sm:$0x1] %v2296_v56  ;;  %v3095_v6 = vpop.f32.mrb[14].mxu0 }
 0x1aa   : > { %v2051_v18 = vcombine.high %v2049_v21, %v2049_v21  ;;  %v2065_v25 = vrot.slane %v2049_v21, %v5038_v5  ;;  %v2072_v16 = vrot.slane %v2050_v41, %v5038_v5  ;;  %v2080_v43 = vcombine.high %v2058_v30, %v2058_v30  ;;  %2940 = vst.sshfl [vmem:[%s5046_s8 + $0x65] sm:$0x1 pattern:$0x73625140] %v2050_v41  ;;  %v3096_v24 = vpop.f32.mrb[15].mxu0 }
 0x1ab   : > { %2941 = vst.sshfl [vmem:[%s5046_s8 + $0x71] sm:$0x1 pattern:$0x73625140] %v2049_v21  ;;  %2403 = vst [vmem:[%s5046_s8 + $0x5e] sm:$0x1] %v2298_v38  ;;  %v3097_v4 = vadd.f32 %v3096_v24, %v3095_v6 }
 0x1ac   : > { %v2079_v42 = vrot.slane %v2051_v18, %v5038_v5  ;;  %v2081_v44 = vcombine.high %v2065_v25, %v2065_v25  ;;  %v2082_v27 = vcombine.high %v2072_v16, %v2072_v16  ;;  %2142 = vst [vmem:[%s5046_s8 + $0x69] sm:$0x1] %v2080_v43  ;;  %2942 = vst.sshfl [vmem:[%s5046_s8 + $0x75] sm:$0x1 pattern:$0x73625140] %v2051_v18 }
 0x1ad   : > { %v1617_v1 = vadd.f32 %v3097_v4, %v5106_v55 }
 0x1ae   : > { %v2083_v2 = vcombine.high %v2079_v42, %v2079_v42  ;;  %2143 = vst [vmem:[%s5046_s8 + $0x6d] sm:$0x1] %v2082_v27  ;;  %2146 = vst [vmem:[%s5046_s8 + $0x79] sm:$0x1] %v2081_v44 }
 0x1af   : > { %v2299_v0 = vcombine.high %v1617_v1, %v1617_v1  ;;  %v2306_v12 = vrot.slane %v1617_v1, %v5038_v5 }
 0x1b0   : > { %2147 = vst [vmem:[%s5046_s8 + $0x7d] sm:$0x1] %v2083_v2 }
 0x1b1   : > { %v2313_v17 = vrot.slane %v2299_v0, %v5038_v5  ;;  %v2314_v13 = vcombine.high %v2306_v12, %v2306_v12  ;;  %v2322_v36 = vrot.slane %v2306_v12, %v5038_v5  ;;  %2955 = vst.sshfl [vmem:[%s5046_s8 + $0x62] sm:$0x1 pattern:$0x73625140] %v2306_v12 }
 0x1b3   : > { %v2315_v55 = vcombine.high %v2313_v17, %v2313_v17  ;;  %v2329_v32 = vrot.slane %v2313_v17, %v5038_v5  ;;  %v2336_v62 = vrot.slane %v2314_v13, %v5038_v5  ;;  %v2344_v34 = vcombine.high %v2322_v36, %v2322_v36  ;;  %2956 = vst.sshfl [vmem:[%s5046_s8 + $0x66] sm:$0x1 pattern:$0x73625140] %v2314_v13 }
 0x1b4   : > { %2957 = vst.sshfl [vmem:[%s5046_s8 + $0x72] sm:$0x1 pattern:$0x73625140] %v2313_v17 }
 0x1b5   : > { %v2343_v57 = vrot.slane %v2315_v55, %v5038_v5  ;;  %v2345_v22 = vcombine.high %v2329_v32, %v2329_v32  ;;  %v2346_v7 = vcombine.high %v2336_v62, %v2336_v62  ;;  %2406 = vst [vmem:[%s5046_s8 + $0x6a] sm:$0x1] %v2344_v34  ;;  %2958 = vst.sshfl [vmem:[%s5046_s8 + $0x76] sm:$0x1 pattern:$0x73625140] %v2315_v55 }
 0x1b7   : > { %v2347_v61 = vcombine.high %v2343_v57, %v2343_v57  ;;  %2407 = vst [vmem:[%s5046_s8 + $0x6e] sm:$0x1] %v2346_v7  ;;  %2410 = vst [vmem:[%s5046_s8 + $0x7a] sm:$0x1] %v2345_v22 }
 0x1b9   : > { %2411 = vst [vmem:[%s5046_s8 + $0x7e] sm:$0x1] %v2347_v61  ;;  %s3363_s8 = scalar_lea.vmem %s3362_s29, 1024 }
 0x1ba   : > { %p3365_p1 = scmp.lt.s32.totalorder %s3363_s8, %s3357_s23 }
 0x1bc   : > { %v3152_v20 = vpop.f32.mrb[8].mxu1  ;;  %p3366_p2 = por %p3365_p1, %p3364_p0 }
 0x1bd   : > { %v2774_v29 = vadd.f32 %v3152_v20, %v2959_v58  ;;  %v2768_v52 = vpop.f32.mrb[9].mxu1 }
 0x1be   : > { %v2769_v9 = vadd.f32 %v2959_v58, %v2768_v52  ;;  %p3367_p3 = pnand %p3366_p2, %p3360_p13 }
 0x1bf   : > { %2788 = vst [vmem:[%s280_s14 + $0x8] sm:$0xff] %v2774_v29 }
 0x1c0   : > { %2787 = vst [vmem:[%s280_s14] sm:$0xff] %v2769_v9 }
 0x1d0   : > { %v3155_v5 = vpop.f32.mrb[10].mxu1 }
 0x1d1   : > { %v2784_v49 = vadd.f32 %v3155_v5, %v2959_v58  ;;  %v2778_v46 = vpop.f32.mrb[11].mxu1 }
 0x1d2   : > { %v2779_v11 = vadd.f32 %v2959_v58, %v2778_v46 }
 0x1d3   : > { %2790 = vst [vmem:[%s280_s14 + $0x18] sm:$0xff] %v2784_v49 }
 0x1d4   : > { %2789 = vst [vmem:[%s280_s14 + $0x10] sm:$0xff] %v2779_v11 }
 0x1d5   : > { %3370 = shalt.err (!%p3367_p3)
}
 0x1d6   : > { %s3371_s19 = scalar_lea.hbm %s5247_s18, 512  ;;  %s3375_s13 = scalar_lea.hbm %s5297_s7, 1024 }
 0x1d7   : > { %p3372_p4 = scmp.ne.s32.totalorder %s5247_s18, %s3371_s19  ;;  %p3376_p9 = scmp.lt.u32.totalorder %s5247_s18, %s5297_s7 }
 0x1d8   : > { %p3377_p10 = scmp.lt.u32.totalorder %s3375_s13, %s3371_s19  ;;  %p3379_p12 = scmp.lt.u32.totalorder %s3371_s19, %s5247_s18 }
 0x1d9   : > { %p3373_p7 = pnand %p3372_p4, %p3503_p5 }
 0x1da   : > { %p3378_p11 = por %p3377_p10, %p3376_p9 }
 0x1db   : > { %p3374_p8 = pneg %p3373_p7 }
 0x1dc   : > { %p3380_p13 = por %p3379_p12, %p3378_p11 }
 0x1de   : > { %p3381_p0 = pnand %p3380_p13, %p3374_p8 }
 0x1e0   : > { %3384 = shalt.err (!%p3381_p0)
}
 0x1e1   : > { %s3423_s20 = smov 128   ;;  %s3424_s21 = smov 8  }
 0x1e2   : > { %3284 = dma.vmem_to_hbm [thread:$0]  (%p3503_p5), %s5242_s15, 512, %s5247_s18, %s5249_s22, %s3423_s20, %s3423_s20, %s3424_s21  }
 0x1e3 PF: > { %p3290_p1 = scmp.ge.s32.totalorder %s3419_s27, 2  ;;  %s2837_s23 = sand.u32 1, %s3407_s24  }
 0x1e4   : > { %s2838_s28 = scalar_lea.sflag [#allocation3], %s2837_s23 }
 0x1e5   : > { %p3287_p2 = pnand %p3290_p1, %p3507_p6 }
 0x1e7   : > { %3402 = dma.done.wait (!%p3287_p2), %s2838_s28, 512  }
 0x1e8   : > { %3404 = vsyncadd (!%p3287_p2), %s2838_s28, 4294966784  ;;  %p18_p3 = scmp.ge.s32.totalorder %s3490_s30, 4   ;;  %s5645_s24 = smov %s3411_s25 }
 0x1e9   : > { %s5646_s25 = smov %s3415_s26  ;;  %s5647_s26 = smov %s3501_s10 }
 0x1ea   : > { %s5648_s27 = smov %s3490_s30  ;;  %20 = sbr.rel (!%p18_p3) target bundleno = 3 (0x3), region = 91 }
 0x1f1   :  { %2843 = vsyncpa [#allocation3], 1 }
 0x1f2   :  { %2845 = vsyncpa [#allocation3 + $0x1], 1 }

</bundles_post_ra>
